<compile_context>
chip_gen: v5e
topology: v5e:2x2
jax: 0.10.0
libtpu: 0.0.40
codegen_flags: <defaults>
</compile_context>

<pallas_src>
import functools

import jax
import jax.numpy as jnp
import numpy as np
from jax import lax
from jax.experimental import pallas as pl
from jax.experimental.pallas import tpu as pltpu


def _vq_kernel(x_ref, emb_ref, esq_ref, q_ref, idx_ref, loss_ref, *,
               tile_n, num_embeddings, embedding_dim, n_valid, use_nor):
    """x_ref: (T, D) f32 rows; emb_ref: (E, D) f32 codebook; esq_ref: (1, E)."""
    T = tile_n
    D = embedding_dim
    E = num_embeddings

    x = x_ref[...]            # (T, D) f32
    emb = emb_ref[...]        # (E, D) f32
    e_sq = esq_ref[...]       # (1, E) f32

    if use_nor:
        # torch.std uses the unbiased estimator (ddof=1).
        i_mean = jnp.mean(x, axis=1, keepdims=True)                       # (T, 1)
        var = jnp.sum((x - i_mean) ** 2, axis=1, keepdims=True) * (1.0 / (D - 1))
        i_std = jnp.sqrt(var)                                             # (T, 1)
        denom = i_std + 1e-07
        inv = pl.reciprocal(denom, approx=False)                          # EUP
        xn = (x - i_mean) * inv
    else:
        xn = x

    # distances' = ||e||^2 - 2 x.e   (per-row ||x||^2 dropped: argmin-invariant)
    # dot_general contracts dim 1 of both operands -> no transpose of emb.
    xe = lax.dot_general(xn, emb, (((1,), (1,)), ((), ())),
                         preferred_element_type=jnp.float32)              # (T, E) MXU
    dist = e_sq - 2.0 * xe

    # argmin over codebook (first occurrence, matching torch.argmin).
    col = lax.broadcasted_iota(jnp.int32, (T, E), 1)
    min_d = jnp.min(dist, axis=1, keepdims=True)
    idx = jnp.min(jnp.where(dist == min_d, col, jnp.int32(E)), axis=1)    # (T,)

    # quantized = one_hot(idx) @ codebook  (same as torch scatter + matmul)
    one_hot = (col == idx[:, None]).astype(jnp.float32)                   # (T, E)
    q = jnp.dot(one_hot, emb, preferred_element_type=jnp.float32)         # (T, D) MXU

    # Per-tile partial sum of squared error; padded rows masked out.
    row = (pl.program_id(0) * T
           + lax.broadcasted_iota(jnp.int32, (T, 1), 0))
    valid = row < n_valid                                                 # (T, 1)
    diff = q - xn
    partial = jnp.sum(jnp.where(valid, diff * diff, 0.0))

    # Straight-through estimator: forward value of quantized is just q.
    if use_nor:
        q_out = q * denom + i_mean
    else:
        q_out = q

    q_ref[...] = q_out.astype(q_ref.dtype)
    idx_ref[...] = idx.reshape(idx_ref.shape).astype(jnp.int32)           # lane-dense
    loss_ref[...] = jnp.full(loss_ref.shape, partial, dtype=jnp.float32)  # lane-dense


def _round_up(a, b):
    return (a + b - 1) // b * b


def vector_quantizer_forward(x, embeddings, *, commitment_cost=0.25, use_nor=True):
    """x: (B, S, D); embeddings: (E, D).  Returns (quantized, loss, indices)."""
    B, S, D = x.shape
    E, De = embeddings.shape
    assert De == D
    N = B * S

    # ---- tile sizing (rows per grid step) -----------------------------------
    VMEM_CAP = 48 << 20  # leave headroom below v7x's 64 MiB physical VMEM

    def _budget(tile_n):
        tile_bytes = tile_n * D * 4
        io = 2 * (2 * tile_bytes + tile_n * 4 + 128 * 4)       # double-buffered I/O
        code = 2 * (E * D * 4 + E * 4)                          # codebook + ||e||^2
        temp = 4 * tile_n * E * 4 + 4 * tile_bytes              # dist/one_hot/etc.
        return io + code + temp

    TILE_N = 1024 if N > 1024 else _round_up(N, 128)
    while TILE_N > 128 and _budget(TILE_N) > VMEM_CAP:
        TILE_N //= 2
    N_pad = _round_up(N, TILE_N)
    G = N_pad // TILE_N

    flat_x = x.reshape(N, D).astype(jnp.float32)
    if N_pad != N:
        flat_x = jnp.pad(flat_x, ((0, N_pad - N), (0, 0)))

    emb_f32 = embeddings.astype(jnp.float32)
    e_sq = jnp.sum(emb_f32 * emb_f32, axis=1)[None, :]          # (1, E), computed once

    kernel = functools.partial(
        _vq_kernel,
        tile_n=TILE_N,
        num_embeddings=E,
        embedding_dim=D,
        n_valid=N,
        use_nor=use_nor,
    )

    vmem_limit = int(min(max(2 * _budget(TILE_N), 4 << 20), VMEM_CAP))

    q_flat, idx_tiles, loss_parts = pl.pallas_call(
        kernel,
        grid=(G,),
        out_shape=(
            jax.ShapeDtypeStruct((N_pad, D), jnp.float32),
            jax.ShapeDtypeStruct((G, TILE_N // 128, 128), jnp.int32),
            jax.ShapeDtypeStruct((G, 1, 128), jnp.float32),
        ),
        in_specs=[
            pl.BlockSpec((TILE_N, D), lambda i: (i, 0)),   # x rows, pipelined
            pl.BlockSpec((E, D), lambda i: (0, 0)),        # codebook, grid-invariant
            pl.BlockSpec((1, E), lambda i: (0, 0)),        # ||e||^2, grid-invariant
        ],
        out_specs=(
            pl.BlockSpec((TILE_N, D), lambda i: (i, 0)),
            pl.BlockSpec((1, TILE_N // 128, 128), lambda i: (i, 0, 0)),
            pl.BlockSpec((1, 1, 128), lambda i: (i, 0, 0)),
        ),
        compiler_params=pltpu.CompilerParams(
            dimension_semantics=("parallel",),
            vmem_limit_bytes=vmem_limit,
        ),
    )(flat_x, emb_f32, e_sq)

    quantized = q_flat[:N].reshape(B, S, D)
    loss = (1.0 + commitment_cost) * jnp.sum(loss_parts[:, 0, 0]) / jnp.float32(N * D)
    indices = idx_tiles.reshape(N_pad, 1)[:N]
    return quantized, loss, indices


def _reference(x, embeddings, commitment_cost, use_nor):
    """Pure-JAX reference mirroring the PyTorch forward (forward values)."""
    B, S, D = x.shape
    if use_nor:
        i_mean = jnp.mean(x, axis=2, keepdims=True)
        i_std = jnp.std(x, axis=2, keepdims=True, ddof=1)
        xn = (x - i_mean) / (i_std + 1e-07)
    else:
        xn = x
    flat = xn.reshape(-1, D)
    dist = (jnp.sum(flat ** 2, axis=1, keepdims=True)
            + jnp.sum(embeddings ** 2, axis=1)
            - 2.0 * flat @ embeddings.T)
    idx = jnp.argmin(dist, axis=1)
    q = embeddings[idx].reshape(xn.shape)
    mse = jnp.mean((q - xn) ** 2)
    loss = mse + commitment_cost * mse
    if use_nor:
        q = q * (i_std + 1e-07) + i_mean
    return q, loss, idx[:, None].astype(jnp.int32)


if __name__ == "__main__":
    # Small shapes consistent with the module: x (B, S, D), codebook (E, D).
    B, S, D, E = 2, 8, 32, 64
    commitment_cost = 0.25
    use_nor = True

    key = jax.random.PRNGKey(0)
    kx, ke = jax.random.split(key)
    x = jax.random.normal(kx, (B, S, D), dtype=jnp.float32)
    # nn.Embedding weight init: uniform(-1/num_embeddings, 1/num_embeddings)
    embeddings = jax.random.uniform(
        ke, (E, D), dtype=jnp.float32, minval=-1.0 / E, maxval=1.0 / E)

    quantized, loss, indices = vector_quantizer_forward(
        x, embeddings, commitment_cost=commitment_cost, use_nor=use_nor)
    jax.block_until_ready((quantized, loss, indices))

    # Check against a pure-JAX reference.
    q_ref, loss_ref, idx_ref = _reference(x, embeddings, commitment_cost, use_nor)
    np.testing.assert_allclose(np.asarray(quantized), np.asarray(q_ref),
                               rtol=1e-4, atol=1e-5)
    np.testing.assert_allclose(np.asarray(loss), np.asarray(loss_ref),
                               rtol=1e-4, atol=1e-6)
    np.testing.assert_array_equal(np.asarray(indices), np.asarray(idx_ref))

    print("KERNEL_OK")
</pallas_src>

<mosaic_0001>
module attributes {stable_mosaic.version = 11 : i64} {
  func.func @_vq_kernel(%arg0: i32, %arg1: memref<128x32xf32, #tpu.memory_space<vmem>>, %arg2: memref<64x32xf32, #tpu.memory_space<vmem>>, %arg3: memref<1x64xf32, #tpu.memory_space<vmem>>, %arg4: memref<128x32xf32, #tpu.memory_space<vmem>>, %arg5: memref<1x1x128xi32, #tpu.memory_space<vmem>>, %arg6: memref<1x1x128xf32, #tpu.memory_space<vmem>>) attributes {dimension_semantics = [#tpu.dimension_semantics<parallel>], iteration_bounds = array<i64: 1>, scalar_prefetch = 0 : i64, scratch_operands = 0 : i64, tpu.core_type = #tpu.core_type<tc>, window_params = [{transform_indices = @transform_0, window_bounds = array<i64: 128, 32>}, {pipeline_mode = #tpu.pipeline_mode<synchronous>, transform_indices = @transform_1, window_bounds = array<i64: 64, 32>}, {pipeline_mode = #tpu.pipeline_mode<synchronous>, transform_indices = @transform_2, window_bounds = array<i64: 1, 64>}, {transform_indices = @transform_3, window_bounds = array<i64: 128, 32>}, {transform_indices = @transform_4, window_bounds = array<i64: 1, 1, 128>}, {transform_indices = @transform_5, window_bounds = array<i64: 1, 1, 128>}]} {
    %c0 = arith.constant 0 : index
    %c0_0 = arith.constant 0 : index
    %0 = vector.load %arg1[%c0, %c0_0] : memref<128x32xf32, #tpu.memory_space<vmem>>, vector<128x32xf32>
    %c0_1 = arith.constant 0 : index
    %c0_2 = arith.constant 0 : index
    %1 = vector.load %arg2[%c0_1, %c0_2] : memref<64x32xf32, #tpu.memory_space<vmem>>, vector<64x32xf32>
    %c0_3 = arith.constant 0 : index
    %c0_4 = arith.constant 0 : index
    %2 = vector.load %arg3[%c0_3, %c0_4] : memref<1x64xf32, #tpu.memory_space<vmem>>, vector<1x64xf32>
    %cst = arith.constant dense<0.000000e+00> : vector<128xf32>
    %3 = vector.multi_reduction <add>, %0, %cst [1] : vector<128x32xf32> to vector<128xf32>
    %4 = vector.shape_cast %3 : vector<128xf32> to vector<128x1xf32>
    %cst_5 = arith.constant 3.200000e+01 : f32
    %5 = vector.broadcast %cst_5 : f32 to vector<128x1xf32>
    %6 = arith.divf %4, %5 : vector<128x1xf32>
    %7 = vector.broadcast %6 : vector<128x1xf32> to vector<128x32xf32>
    %8 = arith.subf %0, %7 : vector<128x32xf32>
    %9 = arith.mulf %8, %8 : vector<128x32xf32>
    %cst_6 = arith.constant dense<0.000000e+00> : vector<128xf32>
    %10 = vector.multi_reduction <add>, %9, %cst_6 [1] : vector<128x32xf32> to vector<128xf32>
    %11 = vector.shape_cast %10 : vector<128xf32> to vector<128x1xf32>
    %cst_7 = arith.constant 0.0322580636 : f32
    %12 = vector.broadcast %cst_7 : f32 to vector<128x1xf32>
    %13 = arith.mulf %11, %12 : vector<128x1xf32>
    %14 = math.sqrt %13 : vector<128x1xf32>
    %cst_8 = arith.constant 1.000000e-07 : f32
    %15 = vector.broadcast %cst_8 : f32 to vector<128x1xf32>
    %16 = arith.addf %14, %15 : vector<128x1xf32>
    %17 = tpu.reciprocal %16 : vector<128x1xf32> -> vector<128x1xf32>
    %18 = vector.broadcast %6 : vector<128x1xf32> to vector<128x32xf32>
    %19 = arith.subf %0, %18 : vector<128x32xf32>
    %20 = vector.broadcast %17 : vector<128x1xf32> to vector<128x32xf32>
    %21 = arith.mulf %19, %20 : vector<128x32xf32>
    %cst_9 = arith.constant dense<0.000000e+00> : vector<128x64xf32>
    %22 = tpu.matmul %21, %1, %cst_9 {dimension_numbers = #tpu.dot_dimension_numbers<[1], [1], [0], [0], [0, 0, 1, 0], [], []>} : vector<128x32xf32>, vector<64x32xf32>, vector<128x64xf32> -> vector<128x64xf32>
    %cst_10 = arith.constant 2.000000e+00 : f32
    %23 = vector.broadcast %cst_10 : f32 to vector<128x64xf32>
    %24 = arith.mulf %23, %22 : vector<128x64xf32>
    %25 = vector.broadcast %2 : vector<1x64xf32> to vector<128x64xf32>
    %26 = arith.subf %25, %24 : vector<128x64xf32>
    %27 = tpu.iota {dimensions = array<i32: 1>} : vector<128x64xi32>
    %cst_11 = arith.constant dense<0x7F800000> : vector<128xf32>
    %28 = vector.multi_reduction <minimumf>, %26, %cst_11 [1] : vector<128x64xf32> to vector<128xf32>
    %29 = vector.shape_cast %28 : vector<128xf32> to vector<128x1xf32>
    %30 = vector.broadcast %29 : vector<128x1xf32> to vector<128x64xf32>
    %31 = arith.cmpf oeq, %26, %30 : vector<128x64xf32>
    %c64_i32 = arith.constant 64 : i32
    %32 = vector.broadcast %c64_i32 : i32 to vector<128x64xi32>
    %33 = arith.select %31, %27, %32 : vector<128x64xi1>, vector<128x64xi32>
    %cst_12 = arith.constant dense<2147483647> : vector<128xi32>
    %34 = vector.multi_reduction <minsi>, %33, %cst_12 [1] : vector<128x64xi32> to vector<128xi32>
    %35 = vector.shape_cast %34 : vector<128xi32> to vector<128x1xi32>
    %36 = vector.broadcast %35 : vector<128x1xi32> to vector<128x64xi32>
    %37 = arith.cmpi eq, %27, %36 : vector<128x64xi32>
    %38 = arith.extui %37 : vector<128x64xi1> to vector<128x64xi32>
    %39 = arith.sitofp %38 : vector<128x64xi32> to vector<128x64xf32>
    %cst_13 = arith.constant dense<0.000000e+00> : vector<128x32xf32>
    %40 = tpu.matmul %39, %1, %cst_13 {dimension_numbers = #tpu.dot_dimension_numbers<[1], [0], [0], [1], [0, 0, 1, 1], [], []>} : vector<128x64xf32>, vector<64x32xf32>, vector<128x32xf32> -> vector<128x32xf32>
    %c128_i32 = arith.constant 128 : i32
    %41 = arith.muli %arg0, %c128_i32 : i32
    %42 = tpu.iota {dimensions = array<i32: 0>} : vector<128x1xi32>
    %43 = vector.broadcast %41 : i32 to vector<128x1xi32>
    %44 = arith.addi %43, %42 : vector<128x1xi32>
    %c16_i32 = arith.constant 16 : i32
    %45 = vector.broadcast %c16_i32 : i32 to vector<128x1xi32>
    %46 = arith.cmpi slt, %44, %45 : vector<128x1xi32>
    %47 = arith.subf %40, %21 : vector<128x32xf32>
    %48 = arith.mulf %47, %47 : vector<128x32xf32>
    %cst_14 = arith.constant 0.000000e+00 : f32
    %49 = vector.shape_cast %46 : vector<128x1xi1> to vector<128x1xi1>
    %50 = vector.broadcast %49 : vector<128x1xi1> to vector<128x32xi1>
    %51 = vector.broadcast %cst_14 : f32 to vector<128x32xf32>
    %52 = arith.select %50, %48, %51 : vector<128x32xi1>, vector<128x32xf32>
    %53 = vector.shape_cast %52 : vector<128x32xf32> to vector<1x128x32xf32>
    %cst_15 = arith.constant dense<0.000000e+00> : vector<1xf32>
    %54 = vector.multi_reduction <add>, %53, %cst_15 [1, 2] : vector<1x128x32xf32> to vector<1xf32>
    %55 = vector.shape_cast %54 : vector<1xf32> to vector<1x1x1xf32>
    %56 = vector.extract %55[0, 0, 0] : f32 from vector<1x1x1xf32>
    %57 = vector.broadcast %16 : vector<128x1xf32> to vector<128x32xf32>
    %58 = arith.mulf %40, %57 : vector<128x32xf32>
    %59 = vector.broadcast %6 : vector<128x1xf32> to vector<128x32xf32>
    %60 = arith.addf %58, %59 : vector<128x32xf32>
    %c0_16 = arith.constant 0 : index
    %c0_17 = arith.constant 0 : index
    %61 = vector.load %arg4[%c0_16, %c0_17] : memref<128x32xf32, #tpu.memory_space<vmem>>, vector<128x32xf32>
    tpu.vector_store %arg4[%c0_16, %c0_17], %60 {strides = array<i32>} : memref<128x32xf32, #tpu.memory_space<vmem>>, vector<128x32xf32>,
    %62 = vector.shape_cast %34 : vector<128xi32> to vector<1x1x128xi32>
    %c0_18 = arith.constant 0 : index
    %c0_19 = arith.constant 0 : index
    %c0_20 = arith.constant 0 : index
    %63 = vector.load %arg5[%c0_18, %c0_19, %c0_20] : memref<1x1x128xi32, #tpu.memory_space<vmem>>, vector<1x1x128xi32>
    tpu.vector_store %arg5[%c0_18, %c0_19, %c0_20], %62 {strides = array<i32>} : memref<1x1x128xi32, #tpu.memory_space<vmem>>, vector<1x1x128xi32>,
    %64 = vector.broadcast %56 : f32 to vector<1x1x128xf32>
    %c0_21 = arith.constant 0 : index
    %c0_22 = arith.constant 0 : index
    %c0_23 = arith.constant 0 : index
    %65 = vector.load %arg6[%c0_21, %c0_22, %c0_23] : memref<1x1x128xf32, #tpu.memory_space<vmem>>, vector<1x1x128xf32>
    tpu.vector_store %arg6[%c0_21, %c0_22, %c0_23], %64 {strides = array<i32>} : memref<1x1x128xf32, #tpu.memory_space<vmem>>, vector<1x1x128xf32>,
    return
  }
  func.func @transform_0(%arg0: i32) -> (i32, i32) {
    %c0_i32 = arith.constant 0 : i32
    %c0_i32_0 = arith.constant 0 : i32
    return %arg0, %c0_i32 : i32, i32
  }
  func.func @transform_1(%arg0: i32) -> (i32, i32) {
    %c0_i32 = arith.constant 0 : i32
    %c0_i32_0 = arith.constant 0 : i32
    %c0_i32_1 = arith.constant 0 : i32
    return %c0_i32, %c0_i32_0 : i32, i32
  }
  func.func @transform_2(%arg0: i32) -> (i32, i32) {
    %c0_i32 = arith.constant 0 : i32
    %c0_i32_0 = arith.constant 0 : i32
    %c0_i32_1 = arith.constant 0 : i32
    return %c0_i32, %c0_i32_0 : i32, i32
  }
  func.func @transform_3(%arg0: i32) -> (i32, i32) {
    %c0_i32 = arith.constant 0 : i32
    %c0_i32_0 = arith.constant 0 : i32
    return %arg0, %c0_i32 : i32, i32
  }
  func.func @transform_4(%arg0: i32) -> (i32, i32, i32) {
    %c0_i32 = arith.constant 0 : i32
    %c0_i32_0 = arith.constant 0 : i32
    %c0_i32_1 = arith.constant 0 : i32
    return %arg0, %c0_i32, %c0_i32_0 : i32, i32, i32
  }
  func.func @transform_5(%arg0: i32) -> (i32, i32, i32) {
    %c0_i32 = arith.constant 0 : i32
    %c0_i32_0 = arith.constant 0 : i32
    %c0_i32_1 = arith.constant 0 : i32
    return %arg0, %c0_i32, %c0_i32_0 : i32, i32, i32
  }
}

</mosaic_0001>

<bundles_post_ra>
// kernel: tpu_custom_call.1
= control target key start
LH: loop header
LB: loop body
LE: loop exit
PB: predicated region body
PF: predicated region fallthrough
CT: control target
= control target key end

     0   :  { %11 = vsyncpa [#allocation3], 0  ;;  %vm44_vm0 = vcmask 261120   ;;  %s3178_s0 = inlined_call_operand.vmem [shape: f32[128,32], index: 0, kind: input, shape index: {}]   ;;  %s3179_s1 = inlined_call_operand.vmem [shape: f32[64,32], index: 1, kind: input, shape index: {}]   ;;  %s3180_s2 = inlined_call_operand.vmem [shape: f32[1,64], index: 2, kind: input, shape index: {}]   ;;  %s3181_s3 = inlined_call_operand.vmem [shape: f32[128,32], index: 3, kind: output, shape index: {0}]   ;;  %s3182_s4 = inlined_call_operand.hbm [shape: s32[1,1,128], index: 4, kind: output, shape index: {1}]   ;;  %s3183_s5 = inlined_call_operand.hbm [shape: f32[1,1,128], index: 5, kind: output, shape index: {2}]  }
   0x1   :  { %v26_v0 = vld [vmem:[%s3178_s0 + $0x38] sm:$0xff]  ;;  %v19_v1 = vld [vmem:[%s3178_s0] sm:$0xff] }
   0x2   :  { %v66_v2 = vsel %vm44_vm0, %v26_v0, 0.0  ;;  %v45_v3 = vsel %vm44_vm0, %v19_v1, 0.0 }
   0x3   :  { %67 = vadd.xlane.f32.xlu1 %v66_v2  ;;  %46 = vadd.xlane.f32.xlu0 %v45_v3 }
   0x4   :  { %12 = vsyncpa [#allocation5], 0  ;;  %v27_v4 = vld [vmem:[%s3178_s0 + $0x40] sm:$0xff]  ;;  %v20_v5 = vld [vmem:[%s3178_s0 + $0x8] sm:$0xff]  ;;  %v1832_v12 = vmov 32.0   ;;  %s1608_s23 = sshll.u32 %s3182_s4, 4  ;;  %s1609_s23 = int_to_ptr.hbm [resolvable:$true] %s1608_s23 }
   0x5   :  { %v69_v6 = vsel %vm44_vm0, %v27_v4, 0.0  ;;  %v48_v7 = vsel %vm44_vm0, %v20_v5, 0.0  ;;  %v1885_v8 = vld [vmem:[%s3178_s0 + $0x50] sm:$0xff]  ;;  %v1892_v10 = vld [vmem:[%s3178_s0 + $0x18] sm:$0xff]  ;;  %1714 = vrcp.f32 %v1832_v12  ;;  %v1925_v33 = vld [vmem:[%s3178_s0 + $0x48] sm:$0xff]  ;;  %s1834_s24 = smov [#allocation2]  }
   0x6   :  { %v75_v9 = vsel %vm44_vm0, %v1885_v8, 0.0  ;;  %v54_v11 = vsel %vm44_vm0, %v1892_v10, 0.0  ;;  %v72_v37 = vsel %vm44_vm0, %v1925_v33, 0.0  ;;  %v1944_v41 = vld [vmem:[%s3178_s0 + $0x10] sm:$0xff]  ;;  %v1949_v42 = vld [vmem:[%s3178_s0 + $0x58] sm:$0xff]  ;;  %v1958_v45 = vld [vmem:[%s3178_s0 + $0x60] sm:$0xff] }
   0x7   :  { %v51_v43 = vsel %vm44_vm0, %v1944_v41, 0.0  ;;  %v78_v44 = vsel %vm44_vm0, %v1949_v42, 0.0  ;;  %v1963_v46 = vld [vmem:[%s3178_s0 + $0x20] sm:$0xff]  ;;  %v81_v47 = vsel %vm44_vm0, %v1958_v45, 0.0  ;;  %v1972_v49 = vld [vmem:[%s3178_s0 + $0x68] sm:$0xff]  ;;  %v1986_v54 = vld [vmem:[%s3178_s0 + $0x70] sm:$0xff] }
   0x8   :  { %v57_v48 = vsel %vm44_vm0, %v1963_v46, 0.0  ;;  %v1977_v50 = vld [vmem:[%s3178_s0 + $0x28] sm:$0xff]  ;;  %v84_v51 = vsel %vm44_vm0, %v1972_v49, 0.0  ;;  %v1994_v56 = vld [vmem:[%s3178_s0 + $0x30] sm:$0xff]  ;;  %v87_v57 = vsel %vm44_vm0, %v1986_v54, 0.0  ;;  %v2007_v61 = vld [vmem:[%s3178_s0 + $0x78] sm:$0xff] }
   0x9   :  { %v60_v52 = vsel %vm44_vm0, %v1977_v50, 0.0  ;;  %v63_v58 = vsel %vm44_vm0, %v1994_v56, 0.0  ;;  %s1606_s0 = sshll.u32 %s1834_s24, 4  ;;  %s1619_s19 = sshll.u32 %s3183_s5, 4  ;;  %s1607_s0 = int_to_ptr.vmem [resolvable:$true] %s1606_s0  ;;  %s1620_s19 = int_to_ptr.hbm [resolvable:$true] %s1619_s19 }
   0xb   :  { %70 = vadd.xlane.f32.xlu1 %v69_v6  ;;  %49 = vadd.xlane.f32.xlu0 %v48_v7  ;;  %v1715_v13 = vpop.eup %1714  ;;  %v41_v6 = vld [vmem:[%s3179_s1 + $0x30] sm:$0xff]  ;;  %v40_v7 = vld [vmem:[%s3179_s1 + $0x28] sm:$0xff] }
   0xc   :  { %v94_v14 = vmul.f32 32.0, %v1715_v13  ;;  %vm98_vm1 = vweird.f32 %v1715_v13 }
   0xe   :  { %v95_v15 = vsub.f32 1.0, %v94_v14  ;;  %v37_v14 = vld [vmem:[%s3179_s1 + $0x10] sm:$0xff] }
  0x10   :  { %v96_v16 = vmul.f32 %v1715_v13, %v95_v15  ;;  %v36_v15 = vld [vmem:[%s3179_s1 + $0x8] sm:$0xff] }
  0x12   :  { %v97_v17 = vadd.f32 %v1715_v13, %v96_v16 }
  0x13   :  { %76 = vadd.xlane.f32.xlu1 %v75_v9  ;;  %v38_v9 = vld [vmem:[%s3179_s1 + $0x18] sm:$0xff] }
  0x14   :  { %v1896_v18 = vsel %vm98_vm1, %v1715_v13, %v97_v17 }
  0x1b   :  { %55 = vadd.xlane.f32.xlu1 %v54_v11 }
  0x76   :  { %v68_v19 = vpop.xlane.xlu1 %67  ;;  %v47_v20 = vpop.xlane.xlu0 %46 }
  0x77   :  { %v1899_v21 = vmul.f32 %v1896_v18, %v68_v19  ;;  %v1902_v22 = vmul.f32 %v1896_v18, %v47_v20 }
  0x79   :  { %3195 = vst [vmem:[#allocation8_spill] sm:$0xff] %v1899_v21  ;;  %v1905_v23 = vsub.f32 %v26_v0, %v1899_v21  ;;  %v1908_v24 = vsub.f32 %v19_v1, %v1902_v22  ;;  %v90_v0 = vsel %vm44_vm0, %v2007_v61, 0.0 }
  0x7b   :  { %v139_v25 = vmul.f32 %v1905_v23, %v1905_v23  ;;  %v132_v26 = vmul.f32 %v1908_v24, %v1908_v24 }
  0x7d   :  { %v169_v27 = vsel %vm44_vm0, %v139_v25, 0.0  ;;  %v148_v28 = vsel %vm44_vm0, %v132_v26, 0.0 }
  0x7e   :  { %v71_v29 = vpop.xlane.xlu1 %70  ;;  %170 = vadd.xlane.f32.xlu1 %v169_v27  ;;  %149 = vadd.xlane.f32.xlu2 %v148_v28  ;;  %v50_v30 = vpop.xlane.xlu0 %49 }
  0x7f   :  { %v1917_v31 = vmul.f32 %v1896_v18, %v71_v29  ;;  %v1920_v32 = vmul.f32 %v1896_v18, %v50_v30  ;;  %v35_v30 = vld [vmem:[%s3179_s1] sm:$0xff] }
  0x81   :  { %3196 = vst [vmem:[#allocation9_spill] sm:$0xff] %v1917_v31  ;;  %v1928_v34 = vsub.f32 %v27_v4, %v1917_v31  ;;  %v1931_v35 = vsub.f32 %v20_v5, %v1920_v32  ;;  %v42_v5 = vld [vmem:[%s3179_s1 + $0x38] sm:$0xff] }
  0x82   :  { %1635 = vmatpush.xpose.msk.msra.mxu0 %vm44_vm0, %v42_v5  ;;  %1691 = vmatpush.xpose.msk.msra.mxu2 %vm44_vm0, %v42_v5 }
  0x83   :  { %v140_v36 = vmul.f32 %v1928_v34, %v1928_v34  ;;  %v133_v38 = vmul.f32 %v1931_v35, %v1931_v35  ;;  %1259 = vmatpush.msra.mxu1 %v42_v5  ;;  %1699 = vmatpush.msra.mxu3 %v42_v5 }
  0x85   :  { %v172_v39 = vsel %vm44_vm0, %v140_v36, 0.0  ;;  %v151_v40 = vsel %vm44_vm0, %v133_v38, 0.0  ;;  %1260 = vmatpush.msra.mxu1 %v41_v6  ;;  %1700 = vmatpush.msra.mxu3 %v41_v6 }
  0x86   :  { %173 = vadd.xlane.f32.xlu1 %v172_v39  ;;  %73 = vadd.xlane.f32.xlu2 %v72_v37  ;;  %v77_v53 = vpop.xlane.xlu1 %76 }
  0x87   :  { %152 = vadd.xlane.f32.xlu0 %v151_v40  ;;  %v1989_v55 = vmul.f32 %v1896_v18, %v77_v53  ;;  %1636 = vmatpush.xpose.msk.msra.mxu0 %vm44_vm0, %v41_v6 }
  0x88   :  { %1692 = vmatpush.xpose.msk.msra.mxu2 %vm44_vm0, %v41_v6  ;;  %1261 = vmatpush.msra.mxu1 %v40_v7 }
  0x89   :  { %v2002_v59 = vsub.f32 %v1885_v8, %v1989_v55  ;;  %1701 = vmatpush.msra.mxu3 %v40_v7  ;;  %v39_v8 = vld [vmem:[%s3179_s1 + $0x20] sm:$0xff] }
  0x8a   :  { %1262 = vmatpush.msra.mxu1 %v39_v8 }
  0x8b   :  { %v142_v62 = vmul.f32 %v2002_v59, %v2002_v59  ;;  %1637 = vmatpush.xpose.msk.msra.mxu0 %vm44_vm0, %v40_v7  ;;  %1702 = vmatpush.msra.mxu3 %v39_v8 }
  0x8c   :  { %1693 = vmatpush.xpose.msk.msra.mxu2 %vm44_vm0, %v40_v7  ;;  %1263 = vmatpush.msra.mxu1 %v38_v9 }
  0x8d   :  { %v178_v1 = vsel %vm44_vm0, %v142_v62, 0.0  ;;  %1703 = vmatpush.msra.mxu3 %v38_v9 }
  0x8e   :  { %52 = vadd.xlane.f32.xlu2 %v51_v43  ;;  %v56_v60 = vpop.xlane.xlu1 %55  ;;  %1264 = vmatpush.msra.mxu1 %v37_v14 }
  0x8f   :  { %79 = vadd.xlane.f32.xlu0 %v78_v44  ;;  %v2012_v63 = vmul.f32 %v1896_v18, %v56_v60  ;;  %1638 = vmatpush.xpose.msk.msra.mxu0 %vm44_vm0, %v39_v8 }
  0x90   :  { %1694 = vmatpush.xpose.msk.msra.mxu2 %vm44_vm0, %v39_v8  ;;  %1704 = vmatpush.msra.mxu3 %v37_v14 }
  0x91   :  { %v2019_v2 = vsub.f32 %v1892_v10, %v2012_v63  ;;  %1265 = vmatpush.msra.mxu1 %v36_v15 }
  0x92   :  { %1705 = vmatpush.msra.mxu3 %v36_v15 }
  0x93   :  { %v135_v3 = vmul.f32 %v2019_v2, %v2019_v2  ;;  %1639 = vmatpush.xpose.msk.msra.mxu0 %vm44_vm0, %v38_v9  ;;  %1266 = vmatpush.msra.mxu1 %v35_v30 }
  0x94   :  { %1695 = vmatpush.xpose.msk.msra.mxu2 %vm44_vm0, %v38_v9  ;;  %1706 = vmatpush.msra.mxu3 %v35_v30 }
  0x95   :  { %v157_v4 = vsel %vm44_vm0, %v135_v3, 0.0 }
  0x96   :  { %82 = vadd.xlane.f32.xlu2 %v81_v47 }
  0x97   :  { %58 = vadd.xlane.f32.xlu0 %v57_v48  ;;  %1640 = vmatpush.xpose.msk.msra.mxu0 %vm44_vm0, %v37_v14 }
  0x98   :  { %1696 = vmatpush.xpose.msk.msra.mxu2 %vm44_vm0, %v37_v14 }
  0x9b   :  { %1641 = vmatpush.xpose.msk.msra.mxu0 %vm44_vm0, %v36_v15 }
  0x9c   :  { %1697 = vmatpush.xpose.msk.msra.mxu2 %vm44_vm0, %v36_v15 }
  0x9e   :  { %85 = vadd.xlane.f32.xlu2 %v84_v51 }
  0x9f   :  { %61 = vadd.xlane.f32.xlu0 %v60_v52  ;;  %1642 = vmatpush.xpose.msk.msra.mxu0 %vm44_vm0, %v35_v30 }
  0xa0   :  { %1698 = vmatpush.xpose.msk.msra.mxu2 %vm44_vm0, %v35_v30 }
  0xa6   :  { %88 = vadd.xlane.f32.xlu2 %v87_v57 }
  0xa7   :  { %64 = vadd.xlane.f32.xlu0 %v63_v58 }
  0xae   :  { %91 = vadd.xlane.f32.xlu2 %v90_v0 }
  0xaf   :  { %179 = vadd.xlane.f32.xlu0 %v178_v1 }
  0xb7   :  { %158 = vadd.xlane.f32.xlu0 %v157_v4 }
  0xf1   :  { %v171_v10 = vpop.xlane.xlu1 %170  ;;  %v150_v11 = vpop.xlane.xlu2 %149 }
  0xf2   :  { %v2049_v12 = vmul.f32 0.032258064, %v171_v10  ;;  %v2051_v13 = vmul.f32 0.032258064, %v150_v11 }
  0xf4   :  { %1716 = vrsqrt.f32 %v2049_v12  ;;  %vm303_vm2 = vcmp.eq.f32.partialorder %v2049_v12, inf  ;;  %vm305_vm3 = vcmp.eq.f32.partialorder %v2049_v12, 0.0  ;;  %v306_v1 = vand.u32 2147483648, %v2049_v12 }
  0xf5   :  { %1718 = vrsqrt.f32 %v2051_v13  ;;  %vm219_vm4 = vcmp.eq.f32.partialorder %v2051_v13, inf  ;;  %vm221_vm5 = vcmp.eq.f32.partialorder %v2051_v13, 0.0  ;;  %v222_v14 = vand.u32 2147483648, %v2051_v13 }
  0xf9   :  { %v174_v16 = vpop.xlane.xlu1 %173  ;;  %v74_v17 = vpop.xlane.xlu2 %73 }
  0xfa   :  { %v1717_v19 = vpop.eup %1716  ;;  %v2065_v20 = vmul.f32 0.032258064, %v174_v16  ;;  %v2068_v25 = vmul.f32 %v1896_v18, %v74_v17  ;;  %v153_v26 = vpop.xlane.xlu0 %152 }
  0xfb   :  { %v1719_v27 = vpop.eup %1718  ;;  %v297_v28 = vmul.f32 %v1717_v19, %v2049_v12  ;;  %v2071_v29 = vmul.f32 0.032258064, %v153_v26 }
  0xfc   :  { %v213_v36 = vmul.f32 %v1719_v27, %v2051_v13  ;;  %1720 = vrsqrt.f32 %v2065_v20  ;;  %v2082_v38 = vsub.f32 %v1925_v33, %v2068_v25  ;;  %vm315_vm6 = vcmp.eq.f32.partialorder %v2065_v20, inf }
  0xfd   :  { %v298_v37 = vmul.f32 %v1717_v19, %v297_v28  ;;  %1722 = vrsqrt.f32 %v2071_v29  ;;  %vm317_vm7 = vcmp.eq.f32.partialorder %v2065_v20, 0.0  ;;  %vm231_vm8 = vcmp.eq.f32.partialorder %v2071_v29, inf }
  0xfe   :  { %v214_v39 = vmul.f32 %v1719_v27, %v213_v36  ;;  %v141_v43 = vmul.f32 %v2082_v38, %v2082_v38  ;;  %vm233_vm9 = vcmp.eq.f32.partialorder %v2071_v29, 0.0 }
  0xff   :  { %v299_v40 = vmul.f32 0.5, %v298_v37 }
 0x100   :  { %v215_v44 = vmul.f32 0.5, %v214_v39  ;;  %v175_v48 = vsel %vm44_vm0, %v141_v43, 0.0 }
 0x101   :  { %v300_v47 = vsub.f32 1.5, %v299_v40  ;;  %v53_v51 = vpop.xlane.xlu2 %52  ;;  %176 = vadd.xlane.f32.xlu1 %v175_v48 }
 0x102   :  { %v1721_v52 = vpop.eup %1720  ;;  %v216_v53 = vsub.f32 1.5, %v215_v44  ;;  %v2090_v33 = vmul.f32 %v1896_v18, %v53_v51  ;;  %v80_v57 = vpop.xlane.xlu0 %79 }
 0x103   :  { %v1723_v58 = vpop.eup %1722  ;;  %v301_v60 = vmul.f32 %v1717_v19, %v300_v47  ;;  %v309_v62 = vmul.f32 %v1721_v52, %v2065_v20  ;;  %v2095_v0 = vmul.f32 %v1896_v18, %v80_v57 }
 0x104   :  { %v217_v3 = vmul.f32 %v1719_v27, %v216_v53  ;;  %v225_v4 = vmul.f32 %v1723_v58, %v2071_v29  ;;  %v2101_v5 = vsub.f32 %v1944_v41, %v2090_v33  ;;  %v318_v53 = vand.u32 2147483648, %v2065_v20 }
 0x105   :  { %v302_v6 = vmul.f32 %v301_v60, %v2049_v12  ;;  %v310_v7 = vmul.f32 %v1721_v52, %v309_v62  ;;  %v2107_v8 = vsub.f32 %v1949_v42, %v2095_v0  ;;  %v234_v60 = vand.u32 2147483648, %v2071_v29 }
 0x106   :  { %v218_v9 = vmul.f32 %v217_v3, %v2051_v13  ;;  %v226_v10 = vmul.f32 %v1723_v58, %v225_v4  ;;  %v134_v11 = vmul.f32 %v2101_v5, %v2101_v5 }
 0x107   :  { %v304_v41 = vsel %vm303_vm2, %v2049_v12, %v302_v6  ;;  %v311_v15 = vmul.f32 0.5, %v310_v7  ;;  %v143_v16 = vmul.f32 %v2107_v8, %v2107_v8 }
 0x108   :  { %v220_v42 = vsel %vm219_vm4, %v2051_v13, %v218_v9  ;;  %v227_v17 = vmul.f32 0.5, %v226_v10  ;;  %v154_v19 = vsel %vm44_vm0, %v134_v11, 0.0  ;;  %v307_v26 = vsel %vm305_vm3, %v306_v1, %v304_v41 }
 0x109   :  { %v312_v27 = vsub.f32 1.5, %v311_v15  ;;  %v83_v28 = vpop.xlane.xlu2 %82  ;;  %v181_v30 = vsel %vm44_vm0, %v143_v16, 0.0  ;;  %v223_v36 = vsel %vm221_vm5, %v222_v14, %v220_v42  ;;  %v2124_v37 = vadd.f32 1e-07, %v307_v26  ;;  %155 = vadd.xlane.f32.xlu1 %v154_v19 }
 0x10a   :  { %v228_v39 = vsub.f32 1.5, %v227_v17  ;;  %v2127_v40 = vmul.f32 %v1896_v18, %v83_v28  ;;  %182 = vadd.xlane.f32.xlu2 %v181_v30  ;;  %v59_v13 = vpop.xlane.xlu0 %58  ;;  %v2129_v43 = vadd.f32 1e-07, %v223_v36 }
 0x10b   :  { %3197 = vst [vmem:[#allocation10_spill] sm:$0xff] %v2124_v37  ;;  %v313_v44 = vmul.f32 %v1721_v52, %v312_v27  ;;  %v2132_v12 = vmul.f32 %v1896_v18, %v59_v13  ;;  %1724 = vrcp.f32 %v2124_v37  ;;  %vm523_vm10 = vweird.f32 %v2124_v37 }
 0x10c   :  { %3198 = vst [vmem:[#allocation11_spill] sm:$0xff] %v2127_v40  ;;  %v229_v47 = vmul.f32 %v1723_v58, %v228_v39  ;;  %v2138_v48 = vsub.f32 %v1958_v45, %v2127_v40  ;;  %1726 = vrcp.f32 %v2129_v43  ;;  %v529_v42 = vand.u32 2147483648, %v2124_v37 }
 0x10d   :  { %v314_v51 = vmul.f32 %v313_v44, %v2065_v20  ;;  %v2145_v52 = vsub.f32 %v1963_v46, %v2132_v12  ;;  %v429_v30 = vand.u32 2147483647, %v2129_v43  ;;  %v431_v36 = vand.u32 2147483648, %v2129_v43 }
 0x10e   :  { %v230_v57 = vmul.f32 %v229_v47, %v2071_v29  ;;  %v144_v58 = vmul.f32 %v2138_v48, %v2138_v48  ;;  %v530_v47 = vor.u32 1.1754944e-38, %v529_v42  ;;  %vm425_vm14 = vweird.f32 %v2129_v43 }
 0x10f   :  { %v316_v45 = vsel %vm315_vm6, %v2065_v20, %v314_v51  ;;  %v136_v62 = vmul.f32 %v2145_v52, %v2145_v52  ;;  %vm2204_vm1 = vcmp.eq.f32.partialorder %v429_v30, 8.507059e+37 }
 0x110   :  { %v232_v1 = vsel %vm231_vm8, %v2071_v29, %v230_v57  ;;  %v184_v46 = vsel %vm44_vm0, %v144_v58, 0.0  ;;  %v319_v7 = vsel %vm317_vm7, %v318_v53, %v316_v45  ;;  %v527_v29 = vand.u32 2147483647, %v2124_v37 }
 0x111   :  { %v1725_v3 = vpop.eup %1724  ;;  %v86_v4 = vpop.xlane.xlu2 %85  ;;  %v160_v6 = vsel %vm44_vm0, %v136_v62, 0.0  ;;  %v235_v20 = vsel %vm233_vm9, %v234_v60, %v232_v1  ;;  %185 = vadd.xlane.f32.xlu1 %v184_v46  ;;  %v2173_v17 = vadd.f32 1e-07, %v319_v7  ;;  %v432_v1 = vor.u32 1.1754944e-38, %v431_v36 }
 0x112   :  { %v1727_v9 = vpop.eup %1726  ;;  %v2162_v10 = vmul.f32 %v1896_v18, %v86_v4  ;;  %161 = vadd.xlane.f32.xlu2 %v160_v6  ;;  %v62_v11 = vpop.xlane.xlu0 %61  ;;  %v519_v41 = vmul.f32 %v1725_v3, %v2124_v37  ;;  %v2166_v14 = vadd.f32 1e-07, %v235_v20  ;;  %vm524_vm11 = vweird.f32 %v1725_v3 }
 0x113   :  { %v2169_v15 = vmul.f32 %v1896_v18, %v62_v11  ;;  %v421_v16 = vmul.f32 %v1727_v9, %v2129_v43  ;;  %3200 = vst [vmem:[#allocation13_spill] sm:$0xff] %v2173_v17  ;;  %vm426_vm12 = vweird.f32 %v1727_v9  ;;  %vm2193_vm13 = vmor %vm523_vm10, %vm524_vm11  ;;  %vm2199_vm15 = vcmp.eq.f32.partialorder %v527_v29, 8.507059e+37 }
 0x114   :  { %3199 = vst [vmem:[#allocation12_spill] sm:$0xff] %v2162_v10  ;;  %v2177_v19 = vsub.f32 %v1972_v49, %v2162_v10  ;;  %v520_v26 = vsub.f32 1.0, %v519_v41  ;;  %1728 = vrcp.f32 %v2166_v14  ;;  %vm427_vm2 = vmor %vm425_vm14, %vm426_vm12  ;;  %v443_v7 = vand.u32 2147483647, %v2166_v14 }
 0x115   :  { %v2182_v27 = vsub.f32 %v1977_v50, %v2169_v15  ;;  %v422_v28 = vsub.f32 1.0, %v421_v16  ;;  %1730 = vrcp.f32 %v2173_v17  ;;  %v445_v11 = vand.u32 2147483648, %v2166_v14 }
 0x116   :  { %v145_v39 = vmul.f32 %v2177_v19, %v2177_v19  ;;  %v521_v13 = vmul.f32 %v1725_v3, %v520_v26  ;;  %vm537_vm3 = vweird.f32 %v2173_v17  ;;  %vm439_vm6 = vweird.f32 %v2166_v14 }
 0x117   :  { %v137_v49 = vmul.f32 %v2182_v27, %v2182_v27  ;;  %v423_v44 = vmul.f32 %v1727_v9, %v422_v28  ;;  %vm444_vm9 = vcmp.eq.f32.partialorder %v443_v7, 8.507059e+37 }
 0x118   :  { %v187_v51 = vsel %vm44_vm0, %v145_v39, 0.0  ;;  %v522_v53 = vadd.f32 %v1725_v3, %v521_v13 }
 0x119   :  { %v89_v58 = vpop.xlane.xlu2 %88  ;;  %188 = vadd.xlane.f32.xlu0 %v187_v51  ;;  %v163_v45 = vsel %vm44_vm0, %v137_v49, 0.0  ;;  %v424_v60 = vadd.f32 %v1727_v9, %v423_v44  ;;  %v543_v49 = vand.u32 2147483648, %v2173_v17 }
 0x11a   :  { %v1729_v46 = vpop.eup %1728  ;;  %v2209_v4 = vmul.f32 %v1896_v18, %v89_v58  ;;  %164 = vadd.xlane.f32.xlu1 %v163_v45  ;;  %v65_v6 = vpop.xlane.xlu0 %64  ;;  %v526_v20 = vsel %vm2193_vm13, %v1725_v3, %v522_v53  ;;  %v446_v45 = vor.u32 1.1754944e-38, %v445_v11 }
 0x11b   :  { %v2217_v41 = vmul.f32 %v1896_v18, %v65_v6  ;;  %v428_v29 = vsel %vm427_vm2, %v1727_v9, %v424_v60  ;;  %v531_v16 = vsel %vm2199_vm15, %v530_v47, %v526_v20  ;;  %v435_v42 = vmul.f32 %v1729_v46, %v2166_v14  ;;  %v1731_v26 = vpop.eup %1730 }
 0x11c   :  { %3207 = vst [vmem:[#allocation14_spill] sm:$0xff] %v2209_v4  ;;  %v2224_v28 = vsub.f32 %v1986_v54, %v2209_v4  ;;  %v433_v3 = vsel %vm2204_vm1, %v432_v1, %v428_v29  ;;  %v651_v30 = vmul.f32 %v531_v16, %v1905_v23  ;;  %v533_v13 = vmul.f32 %v1731_v26, %v2173_v17 }
 0x11d   :  { %3208 = vst [vmem:[#allocation15_spill] sm:$0xff] %v2217_v41  ;;  %v2232_v9 = vsub.f32 %v1994_v56, %v2217_v41  ;;  %v2235_v36 = vmul.f32 %v433_v3, %v1908_v24  ;;  %v436_v39 = vsub.f32 1.0, %v435_v42  ;;  %vm440_vm4 = vweird.f32 %v1729_v46 }
 0x11e   :  { %1650 = vmatmul.msk.f32.vlgmr.msra.gmra.mxu2 %vm44_vm0, %v651_v30  ;;  %v146_v54 = vmul.f32 %v2224_v28, %v2224_v28  ;;  %v541_v23 = vand.u32 2147483647, %v2173_v17  ;;  %v534_v44 = vsub.f32 1.0, %v533_v13  ;;  %vm538_vm5 = vweird.f32 %v1731_v26  ;;  %vm441_vm7 = vmor %vm439_vm6, %vm440_vm4 }
 0x11f   :  { %1643 = vmatmul.msk.f32.vlgmr.msra.gmra.mxu0 %vm44_vm0, %v2235_v36  ;;  %v138_v24 = vmul.f32 %v2232_v9, %v2232_v9  ;;  %v437_v56 = vmul.f32 %v1729_v46, %v436_v39  ;;  %vm539_vm8 = vmor %vm537_vm3, %vm538_vm5  ;;  %v544_v60 = vor.u32 1.1754944e-38, %v543_v49 }
 0x120   :  { %v190_v50 = vsel %vm44_vm0, %v146_v54, 0.0  ;;  %v535_v57 = vmul.f32 %v1731_v26, %v534_v44  ;;  %vm542_vm10 = vcmp.eq.f32.partialorder %v541_v23, 8.507059e+37 }
 0x121   :  { %v92_v47 = vpop.xlane.xlu2 %91  ;;  %191 = vadd.xlane.f32.xlu2 %v190_v50  ;;  %v166_v51 = vsel %vm44_vm0, %v138_v24, 0.0  ;;  %v438_v53 = vadd.f32 %v1729_v46, %v437_v56 }
 0x122   :  { %v2251_v58 = vmul.f32 %v1896_v18, %v92_v47  ;;  %167 = vadd.xlane.f32.xlu0 %v166_v51  ;;  %v536_v1 = vadd.f32 %v1731_v26, %v535_v57 }
 0x123   :  { %v442_v62 = vsel %vm441_vm7, %v1729_v46, %v438_v53 }
 0x124   :  { %3209 = vst [vmem:[#allocation16_spill] sm:$0xff] %v2251_v58  ;;  %v2257_v6 = vsub.f32 %v2007_v61, %v2251_v58  ;;  %v447_v20 = vsel %vm444_vm9, %v446_v45, %v442_v62  ;;  %v540_v18 = vsel %vm539_vm8, %v1731_v26, %v536_v1  ;;  %v180_v61 = vpop.xlane.xlu0 %179 }
 0x125   :  { %v2260_v29 = vmul.f32 %v447_v20, %v1931_v35  ;;  %v545_v16 = vsel %vm542_vm10, %v544_v60, %v540_v18  ;;  %v206_v42 = vmul.f32 0.032258064, %v180_v61 }
 0x126   :  { %v147_v11 = vmul.f32 %v2257_v6, %v2257_v6  ;;  %v652_v46 = vmul.f32 %v545_v16, %v1928_v34 }
 0x127   :  { %1644 = vmatmul.msk.f32.gmra.mxu0 %vm44_vm0, %v2260_v29  ;;  %1732 = vrsqrt.f32 %v206_v42  ;;  %vm339_vm11 = vcmp.eq.f32.partialorder %v206_v42, inf  ;;  %v342_v51 = vand.u32 2147483648, %v206_v42  ;;  %vm341_vm12 = vcmp.eq.f32.partialorder %v206_v42, 0.0 }
 0x128   :  { %v193_v7 = vsel %vm44_vm0, %v147_v11, 0.0  ;;  %1651 = vmatmul.msk.f32.gmra.mxu2 %vm44_vm0, %v652_v46 }
 0x129   :  { %194 = vadd.xlane.f32.xlu1 %v193_v7 }
 0x12c   :  { %v159_v3 = vpop.xlane.xlu0 %158 }
 0x12d   :  { %v199_v35 = vmul.f32 0.032258064, %v159_v3  ;;  %v1733_v26 = vpop.eup %1732 }
 0x12e   :  { %v333_v39 = vmul.f32 %v1733_v26, %v206_v42 }
 0x12f   :  { %1734 = vrsqrt.f32 %v199_v35  ;;  %vm255_vm13 = vcmp.eq.f32.partialorder %v199_v35, inf  ;;  %v258_v45 = vand.u32 2147483648, %v199_v35  ;;  %vm257_vm14 = vcmp.eq.f32.partialorder %v199_v35, 0.0 }
 0x130   :  { %v334_v54 = vmul.f32 %v1733_v26, %v333_v39 }
 0x132   :  { %v335_v49 = vmul.f32 0.5, %v334_v54 }
 0x134   :  { %v336_v34 = vsub.f32 1.5, %v335_v49 }
 0x135   :  { %v1735_v30 = vpop.eup %1734 }
 0x136   :  { %v249_v13 = vmul.f32 %v1735_v30, %v199_v35  ;;  %v337_v44 = vmul.f32 %v1733_v26, %v336_v34 }
 0x138   :  { %v250_v23 = vmul.f32 %v1735_v30, %v249_v13  ;;  %v338_v47 = vmul.f32 %v337_v44, %v206_v42 }
 0x13a   :  { %v251_v24 = vmul.f32 0.5, %v250_v23  ;;  %v340_v57 = vsel %vm339_vm11, %v206_v42, %v338_v47 }
 0x13b   :  { %v343_v62 = vsel %vm341_vm12, %v342_v51, %v340_v57 }
 0x13c   :  { %v252_v56 = vsub.f32 1.5, %v251_v24  ;;  %v2269_v1 = vadd.f32 1e-07, %v343_v62 }
 0x13e   :  { %v253_v50 = vmul.f32 %v1735_v30, %v252_v56  ;;  %1736 = vrcp.f32 %v2269_v1  ;;  %vm565_vm15 = vweird.f32 %v2269_v1  ;;  %v569_v47 = vand.u32 2147483647, %v2269_v1 }
 0x13f   :  { %v571_v51 = vand.u32 2147483648, %v2269_v1 }
 0x140   :  { %v254_v53 = vmul.f32 %v253_v50, %v199_v35  ;;  %vm2321_vm8 = vcmp.eq.f32.partialorder %v569_v47, 8.507059e+37 }
 0x141   :  { %v572_v58 = vor.u32 1.1754944e-38, %v571_v51 }
 0x142   :  { %v256_v60 = vsel %vm255_vm13, %v199_v35, %v254_v53 }
 0x143   :  { %v259_v20 = vsel %vm257_vm14, %v258_v45, %v256_v60 }
 0x144   :  { %v2271_v18 = vadd.f32 1e-07, %v259_v20  ;;  %v2275_v46 = vpop.eup %1736 }
 0x145   :  { %v561_v61 = vmul.f32 %v2275_v46, %v2269_v1  ;;  %vm566_vm1 = vweird.f32 %v2275_v46 }
 0x146   :  { %1738 = vrcp.f32 %v2271_v18  ;;  %vm467_vm2 = vweird.f32 %v2271_v18  ;;  %vm2312_vm5 = vmor %vm565_vm15, %vm566_vm1  ;;  %vm834_vm1 = vcmask 523264  }
 0x147   :  { %v562_v54 = vsub.f32 1.0, %v561_v61 }
 0x149   :  { %v563_v34 = vmul.f32 %v2275_v46, %v562_v54 }
 0x14b   :  { %v564_v61 = vadd.f32 %v2275_v46, %v563_v34 }
 0x14c   :  { %v2277_v7 = vpop.eup %1738 }
 0x14d   :  { %v463_v39 = vmul.f32 %v2277_v7, %v2271_v18  ;;  %vm468_vm3 = vweird.f32 %v2277_v7 }
 0x14e   :  { %vm2317_vm7 = vmor %vm467_vm2, %vm468_vm3 }
 0x14f   :  { %v464_v49 = vsub.f32 1.0, %v463_v39 }
 0x151   :  { %v465_v60 = vmul.f32 %v2277_v7, %v464_v49 }
 0x174   :  { %v177_v16 = vpop.xlane.xlu1 %176 }
 0x175   :  { %v205_v11 = vmul.f32 0.032258064, %v177_v16 }
 0x177   :  { %1740 = vrsqrt.f32 %v205_v11  ;;  %vm327_vm4 = vcmp.eq.f32.partialorder %v205_v11, inf  ;;  %v330_v54 = vand.u32 2147483648, %v205_v11  ;;  %vm329_vm6 = vcmp.eq.f32.partialorder %v205_v11, 0.0 }
 0x17c   :  { %v156_v42 = vpop.xlane.xlu1 %155 }
 0x17d   :  { %v183_v3 = vpop.xlane.xlu2 %182  ;;  %v1741_v35 = vpop.eup %1740  ;;  %v2281_v26 = vmul.f32 0.032258064, %v156_v42  ;;  %v473_v42 = vand.u32 2147483648, %v2271_v18 }
 0x17e   :  { %v2283_v30 = vmul.f32 0.032258064, %v183_v3  ;;  %v321_v13 = vmul.f32 %v1741_v35, %v205_v11 }
 0x17f   :  { %1742 = vrsqrt.f32 %v2281_v26  ;;  %vm243_vm10 = vcmp.eq.f32.partialorder %v2281_v26, inf  ;;  %vm245_vm11 = vcmp.eq.f32.partialorder %v2281_v26, 0.0 }
 0x180   :  { %v322_v23 = vmul.f32 %v1741_v35, %v321_v13  ;;  %1744 = vrsqrt.f32 %v2283_v30  ;;  %vm351_vm12 = vcmp.eq.f32.partialorder %v2283_v30, inf  ;;  %vm353_vm13 = vcmp.eq.f32.partialorder %v2283_v30, 0.0 }
 0x182   :  { %v323_v24 = vmul.f32 0.5, %v322_v23 }
 0x184   :  { %v324_v56 = vsub.f32 1.5, %v323_v24  ;;  %v186_v44 = vpop.xlane.xlu1 %185  ;;  %v466_v24 = vadd.f32 %v2277_v7, %v465_v60  ;;  %v474_v60 = vor.u32 1.1754944e-38, %v473_v42 }
 0x185   :  { %v162_v50 = vpop.xlane.xlu2 %161  ;;  %v1743_v53 = vpop.eup %1742  ;;  %v2293_v57 = vmul.f32 0.032258064, %v186_v44 }
 0x186   :  { %v2295_v45 = vmul.f32 0.032258064, %v162_v50  ;;  %v1745_v62 = vpop.eup %1744  ;;  %v325_v20 = vmul.f32 %v1741_v35, %v324_v56  ;;  %v237_v16 = vmul.f32 %v1743_v53, %v2281_v26  ;;  %v471_v35 = vand.u32 2147483647, %v2271_v18 }
 0x187   :  { %v345_v3 = vmul.f32 %v1745_v62, %v2283_v30  ;;  %1746 = vrsqrt.f32 %v2293_v57  ;;  %v470_v47 = vsel %vm2317_vm7, %v2277_v7, %v466_v24  ;;  %vm363_vm14 = vcmp.eq.f32.partialorder %v2293_v57, inf }
 0x188   :  { %v326_v39 = vmul.f32 %v325_v20, %v205_v11  ;;  %v238_v13 = vmul.f32 %v1743_v53, %v237_v16  ;;  %1748 = vrsqrt.f32 %v2295_v45  ;;  %vm472_vm9 = vcmp.eq.f32.partialorder %v471_v35, 8.507059e+37 }
 0x189   :  { %v346_v23 = vmul.f32 %v1745_v62, %v345_v3  ;;  %v475_v42 = vsel %vm472_vm9, %v474_v60, %v470_v47  ;;  %v354_v60 = vand.u32 2147483648, %v2283_v30  ;;  %vm267_vm15 = vcmp.eq.f32.partialorder %v2295_v45, inf }
 0x18a   :  { %v328_v34 = vsel %vm327_vm4, %v205_v11, %v326_v39  ;;  %v239_v56 = vmul.f32 0.5, %v238_v13  ;;  %v568_v11 = vsel %vm2312_vm5, %v2275_v46, %v564_v61  ;;  %v2351_v44 = vmul.f32 %v475_v42, %v2019_v2 }
 0x18b   :  { %v347_v50 = vmul.f32 0.5, %v346_v23  ;;  %v331_v16 = vsel %vm329_vm6, %v330_v54, %v328_v34  ;;  %vm365_vm4 = vcmp.eq.f32.partialorder %v2293_v57, 0.0  ;;  %vm269_vm5 = vcmp.eq.f32.partialorder %v2295_v45, 0.0 }
 0x18c   :  { %v189_v20 = vpop.xlane.xlu0 %188  ;;  %v240_v31 = vsub.f32 1.5, %v239_v56  ;;  %v2337_v34 = vadd.f32 1e-07, %v331_v16 }
 0x18d   :  { %v165_v17 = vpop.xlane.xlu1 %164  ;;  %v2325_v21 = vmul.f32 0.032258064, %v189_v20  ;;  %v1747_v39 = vpop.eup %1746  ;;  %v348_v56 = vsub.f32 1.5, %v347_v50  ;;  %v246_v50 = vand.u32 2147483648, %v2281_v26 }
 0x18e   :  { %v2330_v13 = vmul.f32 0.032258064, %v165_v17  ;;  %v1749_v54 = vpop.eup %1748  ;;  %v241_v23 = vmul.f32 %v1743_v53, %v240_v31  ;;  %v357_v51 = vmul.f32 %v1747_v39, %v2293_v57  ;;  %v573_v17 = vsel %vm2321_vm8, %v572_v58, %v568_v11 }
 0x18f   :  { %1750 = vrsqrt.f32 %v2325_v21  ;;  %v261_v46 = vmul.f32 %v1749_v54, %v2295_v45  ;;  %v2346_v53 = vmul.f32 %v573_v17, %v2002_v59  ;;  %v349_v49 = vmul.f32 %v1745_v62, %v348_v56  ;;  %v2395_v56 = vld [vmem:[%s3180_s2] ss:$0 sm:$0xff]  ;;  %s1835_s2 = smov [#allocation4]  }
 0x190   :  { %1752 = vrsqrt.f32 %v2330_v13  ;;  %v358_v61 = vmul.f32 %v1747_v39, %v357_v51  ;;  %v242_v7 = vmul.f32 %v241_v23, %v2281_v26  ;;  %vm551_vm2 = vweird.f32 %v2337_v34  ;;  %s1617_s16 = sshll.u32 %s1835_s2, 4  ;;  %s1618_s16 = int_to_ptr.vmem [resolvable:$true] %s1617_s16 }
 0x191   :  { %v262_v35 = vmul.f32 %v1749_v54, %v261_v46  ;;  %1754 = vrcp.f32 %v2337_v34  ;;  %v350_v51 = vmul.f32 %v349_v49, %v2283_v30  ;;  %vm279_vm3 = vcmp.eq.f32.partialorder %v2330_v13, inf }
 0x192   :  { %v359_v31 = vmul.f32 0.5, %v358_v61  ;;  %v244_v11 = vsel %vm243_vm10, %v2281_v26, %v242_v7  ;;  %vm375_vm8 = vcmp.eq.f32.partialorder %v2325_v21, inf  ;;  %vm281_vm9 = vcmp.eq.f32.partialorder %v2330_v13, 0.0 }
 0x193   :  { %v263_v20 = vmul.f32 0.5, %v262_v35  ;;  %v247_v7 = vsel %vm245_vm11, %v246_v50, %v244_v11  ;;  %v352_v26 = vsel %vm351_vm12, %v2283_v30, %v350_v51  ;;  %vm377_vm12 = vcmp.eq.f32.partialorder %v2325_v21, 0.0 }
 0x194   :  { %v192_v24 = vpop.xlane.xlu2 %191  ;;  %v360_v47 = vsub.f32 1.5, %v359_v31  ;;  %v2388_v31 = vadd.f32 1e-07, %v247_v7 }
 0x195   :  { %v2353_v58 = vpop.eup %1750  ;;  %v2357_v16 = vmul.f32 0.032258064, %v192_v24  ;;  %v168_v59 = vpop.xlane.xlu0 %167  ;;  %v264_v61 = vsub.f32 1.5, %v263_v20 }
 0x196   :  { %v1753_v3 = vpop.eup %1752  ;;  %v369_v62 = vmul.f32 %v2353_v58, %v2325_v21  ;;  %v2363_v2 = vmul.f32 0.032258064, %v168_v59  ;;  %v361_v24 = vmul.f32 %v1747_v39, %v360_v47 }
 0x197   :  { %v273_v23 = vmul.f32 %v1753_v3, %v2330_v13  ;;  %1756 = vrsqrt.f32 %v2357_v16  ;;  %v2372_v17 = vpop.eup %1754  ;;  %v265_v39 = vmul.f32 %v1749_v54, %v264_v61  ;;  %v557_v54 = vand.u32 2147483648, %v2337_v34 }
 0x198   :  { %v370_v46 = vmul.f32 %v2353_v58, %v369_v62  ;;  %1758 = vrsqrt.f32 %v2363_v2  ;;  %v547_v20 = vmul.f32 %v2372_v17, %v2337_v34  ;;  %v362_v7 = vmul.f32 %v361_v24, %v2293_v57 }
 0x199   :  { %v274_v42 = vmul.f32 %v1753_v3, %v273_v23  ;;  %v555_v23 = vand.u32 2147483647, %v2337_v34  ;;  %1760 = vrcp.f32 %v2388_v31  ;;  %v355_v61 = vsel %vm353_vm13, %v354_v60, %v352_v26 }
 0x19a   :  { %v371_v49 = vmul.f32 0.5, %v370_v46  ;;  %v548_v62 = vsub.f32 1.0, %v547_v20  ;;  %vm552_vm7 = vweird.f32 %v2372_v17  ;;  %vm387_vm11 = vcmp.eq.f32.partialorder %v2357_v16, inf }
 0x19b   :  { %v275_v59 = vmul.f32 0.5, %v274_v42  ;;  %vm2412_vm6 = vcmp.eq.f32.partialorder %v555_v23, 8.507059e+37  ;;  %vm553_vm10 = vmor %vm551_vm2, %vm552_vm7  ;;  %vm291_vm13 = vcmp.eq.f32.partialorder %v2363_v2, inf }
 0x19c   :  { %v749_v50 = vpop.f32.mrf.mxu0  ;;  %v195_v11 = vpop.xlane.xlu1 %194  ;;  %v372_v35 = vsub.f32 1.5, %v371_v49 }
 0x19d   :  { %v1757_v46 = vpop.eup %1756  ;;  %v797_v47 = vmul.f32 2.0, %v749_v50  ;;  %v2390_v42 = vmul.f32 0.032258064, %v195_v11  ;;  %v276_v51 = vsub.f32 1.5, %v275_v59  ;;  %v266_v50 = vmul.f32 %v265_v39, %v2295_v45 }
 0x19e   :  { %v381_v37 = vmul.f32 %v1757_v46, %v2357_v16  ;;  %v2399_v4 = vpop.eup %1758  ;;  %v549_v11 = vmul.f32 %v2372_v17, %v548_v62  ;;  %v364_v59 = vsel %vm363_vm14, %v2293_v57, %v362_v7  ;;  %v2437_v7 = vadd.f32 1e-07, %v355_v61 }
 0x19f   :  { %1762 = vrsqrt.f32 %v2390_v42  ;;  %v285_v20 = vmul.f32 %v2399_v4, %v2363_v2  ;;  %v2420_v30 = vsub.f32 %v2395_v56, %v797_v47  ;;  %v277_v60 = vmul.f32 %v1753_v3, %v276_v51  ;;  %v1761_v10 = vpop.eup %1760 }
 0x1a0   :  { %v382_v49 = vmul.f32 %v1757_v46, %v381_v37  ;;  %v373_v37 = vmul.f32 %v2353_v58, %v372_v35  ;;  %v550_v62 = vadd.f32 %v2372_v17, %v549_v11  ;;  %v558_v35 = vor.u32 1.1754944e-38, %v557_v54 }
 0x1a1   :  { %v286_v23 = vmul.f32 %v2399_v4, %v285_v20  ;;  %v835_v47 = vsel %vm834_vm1, %v2420_v30, inf  ;;  %v268_v20 = vsel %vm267_vm15, %v2295_v45, %v266_v50  ;;  %v278_v39 = vmul.f32 %v277_v60, %v2330_v13 }
 0x1a2   :  { %v383_v26 = vmul.f32 0.5, %v382_v49  ;;  %836 = vmin.xlane.f32.xlu2 %v835_v47  ;;  %v554_v11 = vsel %vm553_vm10, %v2372_v17, %v550_v62  ;;  %v374_v54 = vmul.f32 %v373_v37, %v2325_v21  ;;  %v459_v37 = vand.u32 2147483648, %v2388_v31 }
 0x1a3   :  { %v287_v3 = vmul.f32 0.5, %v286_v23  ;;  %v449_v23 = vmul.f32 %v1761_v10, %v2388_v31  ;;  %v559_v61 = vsel %vm2412_vm6, %v558_v35, %v554_v11  ;;  %1764 = vrcp.f32 %v2437_v7 }
 0x1a4   :  { %v384_v58 = vsub.f32 1.5, %v383_v26  ;;  %v752_v51 = vpop.f32.mrf.mxu0  ;;  %v653_v50 = vmul.f32 %v559_v61, %v2082_v38  ;;  %vm454_vm14 = vweird.f32 %v1761_v10  ;;  %v402_v35 = vand.u32 2147483648, %v2390_v42 }
 0x1a5   :  { %v1763_v49 = vpop.eup %1762  ;;  %v798_v26 = vmul.f32 2.0, %v752_v51  ;;  %v288_v41 = vsub.f32 1.5, %v287_v3  ;;  %v450_v40 = vsub.f32 1.0, %v449_v23  ;;  %v457_v3 = vand.u32 2147483647, %v2388_v31 }
 0x1a6   :  { %v393_v47 = vmul.f32 %v1763_v49, %v2390_v42  ;;  %v385_v62 = vmul.f32 %v1757_v46, %v384_v58  ;;  %1652 = vmatmul.msk.f32.gmra.mxu2 %vm44_vm0, %v653_v50  ;;  %v280_v46 = vsel %vm279_vm3, %v2330_v13, %v278_v39  ;;  %vm453_vm15 = vweird.f32 %v2388_v31 }
 0x1a7   :  { %v2453_v17 = vsub.f32 %v2395_v56, %v798_v26  ;;  %v451_v24 = vmul.f32 %v1761_v10, %v450_v40  ;;  %v289_v51 = vmul.f32 %v2399_v4, %v288_v41  ;;  %vm399_vm2 = vcmp.eq.f32.partialorder %v2390_v42, inf  ;;  %vm455_vm3 = vmor %vm453_vm15, %vm454_vm14 }
 0x1a8   :  { %v394_v60 = vmul.f32 %v1763_v49, %v393_v47  ;;  %v3218_v11 = vand.u32 2147483648, %v2295_v45  ;;  %v3219_v23 = vand.u32 2147483648, %v2293_v57  ;;  %v386_v47 = vmul.f32 %v385_v62, %v2357_v16 }
 0x1a9   :  { %v838_v38 = vsel %vm834_vm1, %v2453_v17, inf  ;;  %v452_v40 = vadd.f32 %v1761_v10, %v451_v24  ;;  %v460_v50 = vor.u32 1.1754944e-38, %v459_v37  ;;  %v376_v41 = vsel %vm375_vm8, %v2325_v21, %v374_v54  ;;  %v1765_v57 = vpop.eup %1764 }
 0x1aa   :  { %v395_v58 = vmul.f32 0.5, %v394_v60  ;;  %839 = vmin.xlane.f32.xlu0 %v838_v38  ;;  %v271_v26 = vsel %vm269_vm5, %v3218_v11, %v268_v20  ;;  %v367_v39 = vsel %vm365_vm4, %v3219_v23, %v364_v59  ;;  %vm293_vm6 = vcmp.eq.f32.partialorder %v2363_v2, 0.0 }
 0x1ab   :  { %v2479_v4 = vadd.f32 1e-07, %v271_v26  ;;  %v456_v45 = vsel %vm455_vm3, %v1761_v10, %v452_v40  ;;  %vm458_vm5 = vcmp.eq.f32.partialorder %v457_v3, 8.507059e+37  ;;  %v2485_v20 = vadd.f32 1e-07, %v367_v39 }
 0x1ac   :  { %v396_v61 = vsub.f32 1.5, %v395_v58  ;;  %v461_v60 = vsel %vm458_vm5, %v460_v50, %v456_v45  ;;  %v583_v62 = vand.u32 2147483647, %v2437_v7  ;;  %v290_v37 = vmul.f32 %v289_v51, %v2363_v2 }
 0x1ad   :  { %1766 = vrcp.f32 %v2479_v4  ;;  %v646_v24 = vmul.f32 %v461_v60, %v2101_v5  ;;  %v575_v38 = vmul.f32 %v1765_v57, %v2437_v7  ;;  %v3220_v54 = vand.u32 2147483648, %v2330_v13 }
 0x1ae   :  { %v397_v59 = vmul.f32 %v1763_v49, %v396_v61  ;;  %v388_v49 = vsel %vm387_vm11, %v2357_v16, %v386_v47  ;;  %vm389_vm4 = vcmp.eq.f32.partialorder %v2357_v16, 0.0  ;;  %vm579_vm7 = vweird.f32 %v2437_v7  ;;  %1653 = vmatmul.msk.f32.gmra.mxu2 %vm44_vm0, %v2346_v53 }
 0x1af   :  { %v283_v10 = vsel %vm281_vm9, %v3220_v54, %v280_v46  ;;  %v585_v3 = vand.u32 2147483648, %v2437_v7  ;;  %1768 = vrcp.f32 %v2485_v20  ;;  %1645 = vmatmul.msk.f32.gmra.mxu0 %vm44_vm0, %v646_v24  ;;  %v576_v13 = vsub.f32 1.0, %v575_v38 }
 0x1b0   :  { %v398_v5 = vmul.f32 %v397_v59, %v2390_v42  ;;  %vm580_vm8 = vweird.f32 %v1765_v57  ;;  %v485_v46 = vand.u32 2147483647, %v2479_v4  ;;  %v487_v58 = vand.u32 2147483648, %v2479_v4 }
 0x1b1   :  { %v597_v51 = vand.u32 2147483647, %v2485_v20  ;;  %v2510_v40 = vadd.f32 1e-07, %v283_v10  ;;  %v3221_v11 = vand.u32 2147483648, %v2325_v21  ;;  %v292_v23 = vsel %vm291_vm13, %v2363_v2, %v290_v37  ;;  %vm2528_vm11 = vmor %vm579_vm7, %vm580_vm8 }
 0x1b2   :  { %v577_v53 = vmul.f32 %v1765_v57, %v576_v13  ;;  %vm2519_vm9 = vcmp.eq.f32.partialorder %v583_v62, 8.507059e+37  ;;  %vm401_vm10 = vcmp.eq.f32.partialorder %v2390_v42, 0.0  ;;  %v586_v21 = vor.u32 1.1754944e-38, %v585_v3 }
 0x1b3   :  { %v379_v26 = vsel %vm377_vm12, %v3221_v11, %v376_v41  ;;  %v1767_v61 = vpop.eup %1766  ;;  %vm481_vm12 = vweird.f32 %v2479_v4  ;;  %v599_v41 = vand.u32 2147483648, %v2485_v20  ;;  %1770 = vrcp.f32 %v2510_v40 }
 0x1b4   :  { %v2523_v47 = vadd.f32 1e-07, %v379_v26  ;;  %v578_v45 = vadd.f32 %v1765_v57, %v577_v53  ;;  %v477_v59 = vmul.f32 %v1767_v61, %v2479_v4  ;;  %vm593_vm13 = vweird.f32 %v2485_v20 }
 0x1b5   :  { %v1769_v60 = vpop.eup %1768  ;;  %v400_v62 = vsel %vm399_vm2, %v2390_v42, %v398_v5  ;;  %vm2541_vm14 = vcmp.eq.f32.partialorder %v485_v46, 8.507059e+37  ;;  %v488_v24 = vor.u32 1.1754944e-38, %v487_v58  ;;  %vm2545_vm15 = vcmp.eq.f32.partialorder %v597_v51, 8.507059e+37 }
 0x1b6   :  { %1772 = vrcp.f32 %v2523_v47  ;;  %v582_v54 = vsel %vm2528_vm11, %v1765_v57, %v578_v45  ;;  %v478_v10 = vsub.f32 1.0, %v477_v59  ;;  %vm482_vm3 = vweird.f32 %v1767_v61 }
 0x1b7   :  { %v589_v3 = vmul.f32 %v1769_v60, %v2485_v20  ;;  %v587_v13 = vsel %vm2519_vm9, %v586_v21, %v582_v54  ;;  %vm594_vm2 = vweird.f32 %v1769_v60  ;;  %v600_v5 = vor.u32 1.1754944e-38, %v599_v41  ;;  %1646 = vmatmul.msk.f32.gmra.mxu0 %vm44_vm0, %v2351_v44  ;;  %vm2565_vm5 = vmor %vm481_vm12, %vm482_vm3 }
 0x1b8   :  { %v3230_v46 = vand.u32 2147483648, %v2363_v2  ;;  %v655_v51 = vmul.f32 %v587_v13, %v2107_v8  ;;  %v479_v57 = vmul.f32 %v1767_v61, %v478_v10  ;;  %vm495_vm7 = vweird.f32 %v2510_v40  ;;  %vm2582_vm8 = vmor %vm593_vm13, %vm594_vm2 }
 0x1b9   :  { %v590_v11 = vsub.f32 1.0, %v589_v3  ;;  %v1771_v53 = vpop.eup %1770  ;;  %v499_v2 = vand.u32 2147483647, %v2510_v40  ;;  %v3233_v41 = vand.u32 2147483648, %v2357_v16  ;;  %v611_v10 = vand.u32 2147483647, %v2523_v47 }
 0x1ba   :  { %v295_v58 = vsel %vm293_vm6, %v3230_v46, %v292_v23  ;;  %v501_v23 = vand.u32 2147483648, %v2510_v40  ;;  %vm607_vm6 = vweird.f32 %v2523_v47  ;;  %1654 = vmatmul.msk.f32.gmra.mxu2 %vm44_vm0, %v655_v51  ;;  %v480_v44 = vadd.f32 %v1767_v61, %v479_v57 }
 0x1bb   :  { %v2561_v26 = vadd.f32 1e-07, %v295_v58  ;;  %v591_v50 = vmul.f32 %v1769_v60, %v590_v11  ;;  %v491_v21 = vmul.f32 %v1771_v53, %v2510_v40  ;;  %v391_v45 = vsel %vm389_vm4, %v3233_v41, %v388_v49 }
 0x1bc   :  { %v1773_v8 = vpop.eup %1772  ;;  %v613_v3 = vand.u32 2147483648, %v2523_v47  ;;  %v484_v13 = vsel %vm2565_vm5, %v1767_v61, %v480_v44  ;;  %vm496_vm4 = vweird.f32 %v1771_v53  ;;  %v2594_v51 = vadd.f32 1e-07, %v391_v45 }
 0x1bd   :  { %v603_v54 = vmul.f32 %v1773_v8, %v2523_v47  ;;  %1774 = vrcp.f32 %v2561_v26  ;;  %v592_v16 = vadd.f32 %v1769_v60, %v591_v50  ;;  %v492_v49 = vsub.f32 1.0, %v491_v21  ;;  %vm2607_vm11 = vmor %vm495_vm7, %vm496_vm4 }
 0x1be   :  { %v489_v46 = vsel %vm2541_vm14, %v488_v24, %v484_v13  ;;  %vm608_vm9 = vweird.f32 %v1773_v8  ;;  %3236 = vst [vmem:[#allocation17_spill] sm:$0xff] %v2594_v51  ;;  %v403_v61 = vsel %vm401_vm10, %v402_v35, %v400_v62  ;;  %v502_v24 = vor.u32 1.1754944e-38, %v501_v23 }
 0x1bf   :  { %v604_v58 = vsub.f32 1.0, %v603_v54  ;;  %v648_v57 = vmul.f32 %v489_v46, %v2145_v52  ;;  %v596_v11 = vsel %vm2582_vm8, %v1769_v60, %v592_v16  ;;  %v493_v41 = vmul.f32 %v1771_v53, %v492_v49  ;;  %vm2617_vm10 = vmor %vm607_vm6, %vm608_vm9 }
 0x1c0   :  { %v601_v39 = vsel %vm2545_vm15, %v600_v5, %v596_v11  ;;  %1776 = vrcp.f32 %v2594_v51  ;;  %vm500_vm12 = vcmp.eq.f32.partialorder %v499_v2, 8.507059e+37  ;;  %v614_v38 = vor.u32 1.1754944e-38, %v613_v3 }
 0x1c1   :  { %v605_v52 = vmul.f32 %v1773_v8, %v604_v58  ;;  %1647 = vmatmul.msk.f32.gmra.mxu0 %vm44_vm0, %v648_v57  ;;  %v656_v60 = vmul.f32 %v601_v39, %v2138_v48  ;;  %v494_v44 = vadd.f32 %v1771_v53, %v493_v41  ;;  %v2621_v5 = vadd.f32 1e-07, %v403_v61 }
 0x1c2   :  { %vm612_vm13 = vcmp.eq.f32.partialorder %v611_v10, 8.507059e+37  ;;  %v513_v2 = vand.u32 2147483647, %v2561_v26  ;;  %v515_v45 = vand.u32 2147483648, %v2561_v26  ;;  %vm509_vm14 = vweird.f32 %v2561_v26 }
 0x1c3   :  { %v1775_v35 = vpop.eup %1774  ;;  %v606_v62 = vadd.f32 %v1773_v8, %v605_v52  ;;  %3241 = vst [vmem:[#allocation18_spill] sm:$0xff] %v2621_v5  ;;  %1655 = vmatmul.msk.f32.gmra.mxu2 %vm44_vm0, %v656_v60  ;;  %v498_v23 = vsel %vm2607_vm11, %v1771_v53, %v494_v44  ;;  %1778 = vrcp.f32 %v2621_v5  ;;  %vm621_vm5 = vweird.f32 %v2594_v51 }
 0x1c4   :  { %v505_v48 = vmul.f32 %v1775_v35, %v2561_v26  ;;  %v503_v50 = vsel %vm500_vm12, %v502_v24, %v498_v23  ;;  %vm510_vm15 = vweird.f32 %v1775_v35  ;;  %vm2634_vm3 = vcmp.eq.f32.partialorder %v513_v2, 8.507059e+37 }
 0x1c5   :  { %v610_v21 = vsel %vm2617_vm10, %v1773_v8, %v606_v62  ;;  %v649_v53 = vmul.f32 %v503_v50, %v2182_v27  ;;  %vm2639_vm2 = vmor %vm509_vm14, %vm510_vm15  ;;  %v516_v49 = vor.u32 1.1754944e-38, %v515_v45  ;;  %v625_v46 = vand.u32 2147483647, %v2594_v51 }
 0x1c6   :  { %v506_v59 = vsub.f32 1.0, %v505_v48  ;;  %v1777_v54 = vpop.eup %1776  ;;  %v615_v3 = vsel %vm612_vm13, %v614_v38, %v610_v21  ;;  %v627_v58 = vand.u32 2147483648, %v2594_v51  ;;  %vm635_vm4 = vweird.f32 %v2621_v5 }
 0x1c7   :  { %v617_v16 = vmul.f32 %v1777_v54, %v2594_v51  ;;  %v657_v27 = vmul.f32 %v615_v3, %v2177_v19  ;;  %vm622_vm7 = vweird.f32 %v1777_v54  ;;  %vm626_vm8 = vcmp.eq.f32.partialorder %v625_v46, 8.507059e+37 }
 0x1c8   :  { %v507_v10 = vmul.f32 %v1775_v35, %v506_v59  ;;  %vm623_vm6 = vmor %vm621_vm5, %vm622_vm7  ;;  %v628_v52 = vor.u32 1.1754944e-38, %v627_v58  ;;  %v641_v44 = vand.u32 2147483648, %v2621_v5  ;;  %v639_v38 = vand.u32 2147483647, %v2621_v5 }
 0x1c9   :  { %1648 = vmatmul.msk.f32.gmra.mxu0 %vm44_vm0, %v649_v53  ;;  %v618_v11 = vsub.f32 1.0, %v617_v16  ;;  %v1779_v41 = vpop.eup %1778 }
 0x1ca   :  { %v508_v57 = vadd.f32 %v1775_v35, %v507_v10  ;;  %v631_v37 = vmul.f32 %v1779_v41, %v2621_v5  ;;  %vm636_vm9 = vweird.f32 %v1779_v41  ;;  %v642_v50 = vor.u32 1.1754944e-38, %v641_v44 }
 0x1cb   :  { %1656 = vmatmul.msk.f32.gmra.mxu2 %vm44_vm0, %v657_v27  ;;  %v619_v39 = vmul.f32 %v1777_v54, %v618_v11  ;;  %vm637_vm11 = vmor %vm635_vm4, %vm636_vm9  ;;  %vm640_vm12 = vcmp.eq.f32.partialorder %v639_v38, 8.507059e+37 }
 0x1cc   :  { %v512_v61 = vsel %vm2639_vm2, %v1775_v35, %v508_v57  ;;  %v632_v19 = vsub.f32 1.0, %v631_v37 }
 0x1cd   :  { %v517_v24 = vsel %vm2634_vm3, %v516_v49, %v512_v61  ;;  %v620_v60 = vadd.f32 %v1777_v54, %v619_v39 }
 0x1ce   :  { %v650_v42 = vmul.f32 %v517_v24, %v2232_v9  ;;  %v633_v35 = vmul.f32 %v1779_v41, %v632_v19  ;;  %v832_v9 = vlaneseq }
 0x1cf   :  { %v624_v62 = vsel %vm623_vm6, %v1777_v54, %v620_v60 }
 0x1d0   :  { %v629_v23 = vsel %vm626_vm8, %v628_v52, %v624_v62  ;;  %v634_v2 = vadd.f32 %v1779_v41, %v633_v35  ;;  %v2663_v54 = vand.u32 127, %v832_v9 }
 0x1d1   :  { %1649 = vmatmul.msk.f32.gmra.mxu0 %vm44_vm0, %v650_v42  ;;  %v658_v48 = vmul.f32 %v629_v23, %v2224_v28  ;;  %v2667_v28 = vpop.f32.mrf.mxu2 }
 0x1d2   :  { %v638_v21 = vsel %vm637_vm11, %v1779_v41, %v634_v2 }
 0x1d3   :  { %1657 = vmatmul.msk.f32.gmra.mxu2 %vm44_vm0, %v658_v48  ;;  %v643_v45 = vsel %vm640_vm12, %v642_v50, %v638_v21 }
 0x1d4   :  { %v659_v59 = vmul.f32 %v643_v45, %v2257_v6 }
 0x1d9   :  { %v2684_v58 = vpop.f32.mrf.mxu2 }
 0x1db   :  { %1658 = vmatmul.msk.f32.gmra.mxu2 %vm44_vm0, %v659_v59 }
 0x215   :  { %v837_v3 = vpop.xlane.xlu2 %836 }
 0x216   :  { %vm883_vm10 = vcmp.eq.f32.partialorder %v2420_v30, %v837_v3 }
 0x217   :  { %v899_v53 = vsel %vm883_vm10, %v2663_v54, 64 }
 0x218   :  { %v2670_v10 = vsel %vm834_vm1, %v899_v53, 2147483647 }
 0x219   :  { %v917_v13 = vshra.s32 %v2670_v10, 16 }
 0x21b   :  { %v2673_v16 = vcvt.s32.f32 %v917_v13 }
 0x21d   :  { %v840_v6 = vpop.xlane.xlu0 %839  ;;  %920 = vmin.xlane.f32.xlu1 %v2673_v16 }
 0x21e   :  { %vm884_vm13 = vcmp.eq.f32.partialorder %v2453_v17, %v840_v6 }
 0x21f   :  { %v900_v8 = vsel %vm884_vm13, %v2663_v54, 64 }
 0x220   :  { %v2679_v30 = vsel %vm834_vm1, %v900_v8, 2147483647 }
 0x221   :  { %v932_v49 = vshra.s32 %v2679_v30, 16 }
 0x223   :  { %v2682_v46 = vcvt.s32.f32 %v932_v49 }
 0x225   :  { %935 = vmin.xlane.f32.xlu2 %v2682_v46 }
 0x229   :  { %v776_v27 = vpop.f32.mrf.mxu2 }
 0x22a   :  { %v806_v57 = vmul.f32 2.0, %v776_v27 }
 0x22c   :  { %v755_v11 = vpop.f32.mrf.mxu0  ;;  %v2688_v17 = vsub.f32 %v2395_v56, %v806_v57 }
 0x22d   :  { %v799_v41 = vmul.f32 2.0, %v755_v11 }
 0x22e   :  { %v862_v61 = vsel %vm834_vm1, %v2688_v17, inf }
 0x22f   :  { %v2693_v39 = vsub.f32 %v2395_v56, %v799_v41  ;;  %863 = vmin.xlane.f32.xlu0 %v862_v61 }
 0x231   :  { %v841_v37 = vsel %vm834_vm1, %v2693_v39, inf  ;;  %v779_v24 = vpop.f32.mrf.mxu2 }
 0x232   :  { %842 = vmin.xlane.f32.xlu1 %v841_v37  ;;  %v807_v52 = vmul.f32 2.0, %v779_v24 }
 0x234   :  { %v758_v60 = vpop.f32.mrf.mxu0  ;;  %v2698_v44 = vsub.f32 %v2395_v56, %v807_v52 }
 0x235   :  { %v800_v19 = vmul.f32 2.0, %v758_v60 }
 0x236   :  { %v865_v42 = vsel %vm834_vm1, %v2698_v44, inf }
 0x237   :  { %v2703_v62 = vsub.f32 %v2395_v56, %v800_v19  ;;  %866 = vmin.xlane.f32.xlu2 %v865_v42 }
 0x239   :  { %v844_v35 = vsel %vm834_vm1, %v2703_v62, inf }
 0x23a   :  { %845 = vmin.xlane.f32.xlu0 %v844_v35 }
 0x23d   :  { %v782_v38 = vpop.f32.mrf.mxu2 }
 0x23e   :  { %v761_v23 = vpop.f32.mrf.mxu0  ;;  %v808_v48 = vmul.f32 2.0, %v782_v38 }
 0x23f   :  { %v801_v2 = vmul.f32 2.0, %v761_v23 }
 0x240   :  { %v2708_v50 = vsub.f32 %v2395_v56, %v808_v48 }
 0x241   :  { %v2711_v21 = vsub.f32 %v2395_v56, %v801_v2 }
 0x242   :  { %v868_v45 = vsel %vm834_vm1, %v2708_v50, inf }
 0x243   :  { %v847_v59 = vsel %vm834_vm1, %v2711_v21, inf  ;;  %869 = vmin.xlane.f32.xlu1 %v868_v45 }
 0x244   :  { %848 = vmin.xlane.f32.xlu2 %v847_v59  ;;  %v916_v59 = vand.u32 65535, %v2670_v10 }
 0x246   :  { %v785_v9 = vpop.f32.mrf.mxu2  ;;  %v764_v3 = vpop.f32.mrf.mxu0 }
 0x247   :  { %v809_v53 = vmul.f32 2.0, %v785_v9  ;;  %v802_v13 = vmul.f32 2.0, %v764_v3  ;;  %v918_v3 = vcvt.s32.f32 %v916_v59 }
 0x249   :  { %v2718_v6 = vsub.f32 %v2395_v56, %v809_v53  ;;  %v2721_v8 = vsub.f32 %v2395_v56, %v802_v13  ;;  %v931_v13 = vand.u32 65535, %v2679_v30 }
 0x24b   :  { %v871_v49 = vsel %vm834_vm1, %v2718_v6, inf  ;;  %v850_v27 = vsel %vm834_vm1, %v2721_v8, inf }
 0x24c   :  { %872 = vmin.xlane.f32.xlu0 %v871_v49  ;;  %851 = vmin.xlane.f32.xlu2 %v850_v27  ;;  %v933_v27 = vcvt.s32.f32 %v931_v13 }
 0x24e   :  { %v788_v57 = vpop.f32.mrf.mxu2  ;;  %v767_v11 = vpop.f32.mrf.mxu0 }
 0x24f   :  { %v810_v41 = vmul.f32 2.0, %v788_v57  ;;  %v803_v61 = vmul.f32 2.0, %v767_v11  ;;  %v804_v11 = vmul.f32 2.0, %v2667_v28 }
 0x251   :  { %v2728_v37 = vsub.f32 %v2395_v56, %v803_v61  ;;  %v2731_v24 = vsub.f32 %v2395_v56, %v810_v41  ;;  %v2759_v10 = vsub.f32 %v2395_v56, %v804_v11 }
 0x253   :  { %v874_v52 = vsel %vm834_vm1, %v2731_v24, inf  ;;  %v853_v60 = vsel %vm834_vm1, %v2728_v37, inf }
 0x254   :  { %875 = vmin.xlane.f32.xlu0 %v874_v52  ;;  %854 = vmin.xlane.f32.xlu2 %v853_v60 }
 0x256   :  { %v791_v19 = vpop.f32.mrf.mxu2 }
 0x257   :  { %v811_v42 = vmul.f32 2.0, %v791_v19 }
 0x259   :  { %v2738_v35 = vsub.f32 %v2395_v56, %v811_v42 }
 0x25b   :  { %v877_v38 = vsel %vm834_vm1, %v2738_v35, inf }
 0x25c   :  { %878 = vmin.xlane.f32.xlu0 %v877_v38 }
 0x25e   :  { %v794_v23 = vpop.f32.mrf.mxu2 }
 0x25f   :  { %v812_v48 = vmul.f32 2.0, %v794_v23 }
 0x261   :  { %v2743_v2 = vsub.f32 %v2395_v56, %v812_v48 }
 0x263   :  { %v880_v45 = vsel %vm834_vm1, %v2743_v2, inf }
 0x264   :  { %881 = vmin.xlane.f32.xlu0 %v880_v45 }
 0x290   :  { %v2748_v9 = vpop.xlane.xlu1 %920 }
 0x291   :  { %vm922_vm14 = vcmp.eq.f32.partialorder %v2673_v16, %v2748_v9  ;;  %v856_v16 = vsel %vm834_vm1, %v2759_v10, inf }
 0x292   :  { %v923_v53 = vsel %vm922_vm14, %v918_v3, inf  ;;  %vm1538_vm14 = vcmask 130112  }
 0x293   :  { %924 = vmin.xlane.f32.xlu1 %v923_v53 }
 0x298   :  { %v2753_v49 = vpop.xlane.xlu2 %935 }
 0x299   :  { %vm937_vm15 = vcmp.eq.f32.partialorder %v2682_v46, %v2753_v49 }
 0x29a   :  { %v938_v57 = vsel %vm937_vm15, %v933_v27, inf }
 0x29b   :  { %939 = vmin.xlane.f32.xlu1 %v938_v57 }
 0x2a2   :  { %v864_v41 = vpop.xlane.xlu0 %863 }
 0x2a3   :  { %857 = vmin.xlane.f32.xlu1 %v856_v16  ;;  %vm892_vm3 = vcmp.eq.f32.partialorder %v2688_v17, %v864_v41  ;;  %v805_v17 = vmul.f32 2.0, %v2684_v58 }
 0x2a4   :  { %v908_v30 = vsel %vm892_vm3, %v2663_v54, 64 }
 0x2a5   :  { %v843_v61 = vpop.xlane.xlu1 %842  ;;  %v2766_v52 = vsel %vm834_vm1, %v908_v30, 2147483647  ;;  %v2789_v59 = vsub.f32 %v2395_v56, %v805_v17 }
 0x2a6   :  { %vm885_vm2 = vcmp.eq.f32.partialorder %v2693_v39, %v843_v61  ;;  %v1052_v46 = vshra.s32 %v2766_v52, 16 }
 0x2a7   :  { %v901_v28 = vsel %vm885_vm2, %v2663_v54, 64  ;;  %v859_v27 = vsel %vm834_vm1, %v2789_v59, inf }
 0x2a8   :  { %v2772_v60 = vsel %vm834_vm1, %v901_v28, 2147483647  ;;  %v2774_v19 = vcvt.s32.f32 %v1052_v46 }
 0x2a9   :  { %v947_v42 = vshra.s32 %v2772_v60, 16 }
 0x2aa   :  { %v867_v38 = vpop.xlane.xlu2 %866  ;;  %1055 = vmin.xlane.f32.xlu2 %v2774_v19 }
 0x2ab   :  { %v2779_v23 = vcvt.s32.f32 %v947_v42  ;;  %vm893_vm5 = vcmp.eq.f32.partialorder %v2698_v44, %v867_v38 }
 0x2ac   :  { %v909_v39 = vsel %vm893_vm5, %v2663_v54, 64 }
 0x2ad   :  { %v846_v48 = vpop.xlane.xlu0 %845  ;;  %950 = vmin.xlane.f32.xlu1 %v2779_v23  ;;  %v2785_v45 = vsel %vm834_vm1, %v909_v39, 2147483647 }
 0x2ae   :  { %vm886_vm7 = vcmp.eq.f32.partialorder %v2703_v62, %v846_v48  ;;  %v1067_v3 = vshra.s32 %v2785_v45, 16 }
 0x2af   :  { %v902_v58 = vsel %vm886_vm7, %v2663_v54, 64 }
 0x2b0   :  { %v2794_v53 = vsel %vm834_vm1, %v902_v58, 2147483647  ;;  %v2796_v44 = vcvt.s32.f32 %v1067_v3 }
 0x2b1   :  { %v962_v13 = vshra.s32 %v2794_v53, 16 }
 0x2b2   :  { %1070 = vmin.xlane.f32.xlu0 %v2796_v44  ;;  %860 = vmin.xlane.f32.xlu2 %v859_v27 }
 0x2b3   :  { %v2802_v62 = vcvt.s32.f32 %v962_v13 }
 0x2b5   :  { %965 = vmin.xlane.f32.xlu1 %v2802_v62 }
 0x2b6   :  { %v870_v56 = vpop.xlane.xlu1 %869 }
 0x2b7   :  { %v849_v57 = vpop.xlane.xlu2 %848  ;;  %vm894_vm6 = vcmp.eq.f32.partialorder %v2708_v50, %v870_v56 }
 0x2b8   :  { %vm887_vm8 = vcmp.eq.f32.partialorder %v2711_v21, %v849_v57  ;;  %v910_v11 = vsel %vm894_vm6, %v2663_v54, 64 }
 0x2b9   :  { %v903_v16 = vsel %vm887_vm8, %v2663_v54, 64  ;;  %v2810_v41 = vsel %vm834_vm1, %v910_v11, 2147483647 }
 0x2ba   :  { %v2813_v30 = vsel %vm834_vm1, %v903_v16, 2147483647  ;;  %v1082_v61 = vshra.s32 %v2810_v41, 16 }
 0x2bb   :  { %v977_v28 = vshra.s32 %v2813_v30, 16 }
 0x2bc   :  { %v2817_v46 = vcvt.s32.f32 %v1082_v61 }
 0x2bd   :  { %v2819_v42 = vcvt.s32.f32 %v977_v28 }
 0x2be   :  { %1085 = vmin.xlane.f32.xlu2 %v2817_v46 }
 0x2bf   :  { %v873_v50 = vpop.xlane.xlu0 %872  ;;  %980 = vmin.xlane.f32.xlu0 %v2819_v42  ;;  %v852_v21 = vpop.xlane.xlu2 %851 }
 0x2c0   :  { %vm895_vm4 = vcmp.eq.f32.partialorder %v2718_v6, %v873_v50  ;;  %vm888_vm9 = vcmp.eq.f32.partialorder %v2721_v8, %v852_v21 }
 0x2c1   :  { %v911_v17 = vsel %vm895_vm4, %v2663_v54, 64  ;;  %v904_v38 = vsel %vm888_vm9, %v2663_v54, 64 }
 0x2c2   :  { %v2828_v39 = vsel %vm834_vm1, %v911_v17, 2147483647  ;;  %v2831_v48 = vsel %vm834_vm1, %v904_v38, 2147483647 }
 0x2c3   :  { %v1097_v58 = vshra.s32 %v2828_v39, 16  ;;  %v992_v3 = vshra.s32 %v2831_v48, 16 }
 0x2c5   :  { %v2835_v13 = vcvt.s32.f32 %v1097_v58  ;;  %v2837_v27 = vcvt.s32.f32 %v992_v3  ;;  %v927_v3 = vcvt.f32.s32 %v2748_v9 }
 0x2c7   :  { %1100 = vmin.xlane.f32.xlu1 %v2835_v13  ;;  %v876_v6 = vpop.xlane.xlu0 %875  ;;  %v855_v8 = vpop.xlane.xlu2 %854  ;;  %995 = vmin.xlane.f32.xlu2 %v2837_v27 }
 0x2c8   :  { %vm896_vm11 = vcmp.eq.f32.partialorder %v2731_v24, %v876_v6  ;;  %vm889_vm12 = vcmp.eq.f32.partialorder %v2728_v37, %v855_v8  ;;  %v928_v8 = vshll.u32 %v927_v3, 16 }
 0x2c9   :  { %v912_v56 = vsel %vm896_vm11, %v2663_v54, 64  ;;  %v905_v57 = vsel %vm889_vm12, %v2663_v54, 64 }
 0x2ca   :  { %v2846_v11 = vsel %vm834_vm1, %v912_v56, 2147483647  ;;  %v2849_v16 = vsel %vm834_vm1, %v905_v57, 2147483647 }
 0x2cb   :  { %v1112_v61 = vshra.s32 %v2846_v11, 16  ;;  %v1007_v28 = vshra.s32 %v2849_v16, 16 }
 0x2cd   :  { %v2853_v50 = vcvt.s32.f32 %v1112_v61  ;;  %v2855_v21 = vcvt.s32.f32 %v1007_v28  ;;  %v942_v61 = vcvt.f32.s32 %v2753_v49 }
 0x2cf   :  { %1115 = vmin.xlane.f32.xlu0 %v2853_v50  ;;  %v879_v37 = vpop.xlane.xlu0 %878  ;;  %1010 = vmin.xlane.f32.xlu1 %v2855_v21 }
 0x2d0   :  { %vm897_vm10 = vcmp.eq.f32.partialorder %v2738_v35, %v879_v37  ;;  %v1833_v35 = vmov 0.0  }
 0x2d1   :  { %v913_v24 = vsel %vm897_vm10, %v2663_v54, 64 }
 0x2d2   :  { %v2862_v17 = vsel %vm834_vm1, %v913_v24, 2147483647  ;;  %v943_v24 = vshll.u32 %v942_v61, 16 }
 0x2d3   :  { %v1127_v38 = vshra.s32 %v2862_v17, 16 }
 0x2d5   :  { %v2865_v58 = vcvt.s32.f32 %v1127_v38  ;;  %v1536_v38 = vadd.s32 4294967288, %v2663_v54 }
 0x2d7   :  { %1130 = vmin.xlane.f32.xlu2 %v2865_v58 }
 0x306   :  { %v925_v6 = vpop.xlane.xlu1 %924 }
 0x307   :  { %v926_v56 = vcvt.f32.s32 %v925_v6 }
 0x309   :  { %v929_v57 = vadd.s32 %v928_v8, %v926_v56  ;;  %v882_v56 = vpop.xlane.xlu0 %881 }
 0x30a   :  { %vm898_vm2 = vcmp.eq.f32.partialorder %v2743_v2, %v882_v56 }
 0x30b   :  { %vm1155_vm13 = vcmp.eq.s32.totalorder %v2663_v54, %v929_v57  ;;  %v1535_v9 = vperm.slane %v929_v57, %v2663_v54  ;;  %v1051_v57 = vand.u32 65535, %v2766_v52 }
 0x30c   :  { %v1659_v28 = vsel %vm1155_vm13, 1.0, %v1833_v35 }
 0x30d   :  { %1675 = vmatmul.msk.f32.vlgmr.msra.gmra.mxu1 %vm834_vm1, %v1659_v28 }
 0x30e   :  { %v940_v37 = vpop.xlane.xlu1 %939 }
 0x30f   :  { %v941_v5 = vcvt.f32.s32 %v940_v37  ;;  %v946_v37 = vand.u32 65535, %v2772_v60 }
 0x311   :  { %v944_v51 = vadd.s32 %v943_v24, %v941_v5  ;;  %v914_v24 = vsel %vm898_vm2, %v2663_v54, 64 }
 0x312   :  { %v2898_v2 = vsel %vm834_vm1, %v914_v24, 2147483647 }
 0x313   :  { %v1537_v3 = vperm.slane %v944_v51, %v1536_v38  ;;  %vm1156_vm15 = vcmp.eq.s32.totalorder %v2663_v54, %v944_v51 }
 0x314   :  { %v1660_v49 = vsel %vm1156_vm15, 1.0, %v1833_v35 }
 0x315   :  { %v2877_v6 = vsel %vm1538_vm14, %v1537_v3, %v1535_v9  ;;  %1676 = vmatmul.msk.f32.gmra.mxu1 %vm834_vm1, %v1660_v49  ;;  %v948_v3 = vcvt.s32.f32 %v946_v37  ;;  %v1066_v49 = vand.u32 65535, %v2785_v45 }
 0x316   :  { %v858_v8 = vpop.xlane.xlu1 %857 }
 0x317   :  { %vm890_vm3 = vcmp.eq.f32.partialorder %v2759_v10, %v858_v8  ;;  %v1053_v10 = vcvt.s32.f32 %v1051_v57  ;;  %v1142_v8 = vshra.s32 %v2898_v2, 16 }
 0x318   :  { %v906_v61 = vsel %vm890_vm3, %v2663_v54, 64 }
 0x319   :  { %v2883_v5 = vsel %vm834_vm1, %v906_v61, 2147483647  ;;  %v2909_v57 = vcvt.s32.f32 %v1142_v8 }
 0x31a   :  { %v1022_v51 = vshra.s32 %v2883_v5, 16 }
 0x31c   :  { %v2888_v28 = vcvt.s32.f32 %v1022_v51 }
 0x31d   :  { %v2892_v38 = vpop.xlane.xlu2 %1055 }
 0x31e   :  { %1025 = vmin.xlane.f32.xlu1 %v2888_v28  ;;  %vm1057_vm5 = vcmp.eq.f32.partialorder %v2774_v19, %v2892_v38  ;;  %v1068_v19 = vcvt.s32.f32 %v1066_v49 }
 0x31f   :  { %v1058_v52 = vsel %vm1057_vm5, %v1053_v10, inf  ;;  %vm1542_vm5 = vcmask 195712  }
 0x320   :  { %v2900_v9 = vpop.xlane.xlu1 %950  ;;  %1059 = vmin.xlane.f32.xlu0 %v1058_v52  ;;  %v1081_v52 = vand.u32 65535, %v2810_v41  ;;  %v1096_v41 = vand.u32 65535, %v2828_v39  ;;  %v1111_v39 = vand.u32 65535, %v2846_v11  ;;  %v1126_v11 = vand.u32 65535, %v2862_v17 }
 0x321   :  { %vm952_vm7 = vcmp.eq.f32.partialorder %v2779_v23, %v2900_v9  ;;  %v1062_v17 = vcvt.f32.s32 %v2892_v38 }
 0x322   :  { %v953_v60 = vsel %vm952_vm7, %v948_v3, inf  ;;  %v976_v3 = vand.u32 65535, %v2813_v30  ;;  %v991_v30 = vand.u32 65535, %v2831_v48  ;;  %v1006_v48 = vand.u32 65535, %v2849_v16 }
 0x323   :  { %954 = vmin.xlane.f32.xlu2 %v953_v60  ;;  %v1128_v16 = vcvt.s32.f32 %v1126_v11 }
 0x325   :  { %v861_v56 = vpop.xlane.xlu2 %860  ;;  %v2906_v61 = vpop.xlane.xlu0 %1070 }
 0x326   :  { %vm891_vm6 = vcmp.eq.f32.partialorder %v2789_v59, %v861_v56  ;;  %vm1072_vm8 = vcmp.eq.f32.partialorder %v2796_v44, %v2906_v61  ;;  %v961_v59 = vand.u32 65535, %v2794_v53  ;;  %v1083_v56 = vcvt.s32.f32 %v1081_v52 }
 0x327   :  { %v907_v51 = vsel %vm891_vm6, %v2663_v54, 64  ;;  %v1073_v23 = vsel %vm1072_vm8, %v1068_v19, inf }
 0x328   :  { %v2915_v37 = vsel %vm834_vm1, %v907_v51, 2147483647  ;;  %1145 = vmin.xlane.f32.xlu0 %v2909_v57  ;;  %1074 = vmin.xlane.f32.xlu1 %v1073_v23  ;;  %v2918_v45 = vpop.xlane.xlu1 %965  ;;  %v963_v44 = vcvt.s32.f32 %v961_v59  ;;  %v993_v59 = vcvt.s32.f32 %v991_v30 }
 0x329   :  { %v1037_v24 = vshra.s32 %v2915_v37, 16  ;;  %vm967_vm4 = vcmp.eq.f32.partialorder %v2802_v62, %v2918_v45  ;;  %v978_v62 = vcvt.s32.f32 %v976_v3  ;;  %v1113_v3 = vcvt.s32.f32 %v1111_v39 }
 0x32a   :  { %v968_v8 = vsel %vm967_vm4, %v963_v44, inf }
 0x32b   :  { %v2922_v10 = vcvt.s32.f32 %v1037_v24  ;;  %v1098_v24 = vcvt.s32.f32 %v1096_v41 }
 0x32d   :  { %1040 = vmin.xlane.f32.xlu2 %v2922_v10 }
 0x330   :  { %969 = vmin.xlane.f32.xlu0 %v968_v8  ;;  %v1008_v8 = vcvt.s32.f32 %v1006_v48 }
 0x331   :  { %v2929_v60 = vpop.xlane.xlu2 %1085 }
 0x332   :  { %v2931_v49 = vpop.xlane.xlu0 %980  ;;  %vm1087_vm9 = vcmp.eq.f32.partialorder %v2817_v46, %v2929_v60 }
 0x333   :  { %v1088_v53 = vsel %vm1087_vm9, %v1083_v56, inf  ;;  %vm982_vm11 = vcmp.eq.f32.partialorder %v2819_v42, %v2931_v49  ;;  %vm1546_vm9 = vcmask 261312  }
 0x334   :  { %1089 = vmin.xlane.f32.xlu1 %v1088_v53  ;;  %v983_v19 = vsel %vm982_vm11, %v978_v62, inf }
 0x335   :  { %984 = vmin.xlane.f32.xlu2 %v983_v19 }
 0x33a   :  { %v2939_v51 = vpop.xlane.xlu1 %1100  ;;  %v2941_v23 = vpop.xlane.xlu2 %995 }
 0x33b   :  { %vm1102_vm12 = vcmp.eq.f32.partialorder %v2835_v13, %v2939_v51  ;;  %vm997_vm10 = vcmp.eq.f32.partialorder %v2837_v27, %v2941_v23 }
 0x33c   :  { %v1103_v46 = vsel %vm1102_vm12, %v1098_v24, inf  ;;  %v998_v42 = vsel %vm997_vm10, %v993_v59, inf  ;;  %v957_v24 = vcvt.f32.s32 %v2900_v9  ;;  %vm1550_vm10 = vcmask 326912  }
 0x33d   :  { %1104 = vmin.xlane.f32.xlu0 %v1103_v46  ;;  %999 = vmin.xlane.f32.xlu1 %v998_v42  ;;  %v1063_v46 = vshll.u32 %v1062_v17, 16 }
 0x342   :  { %v2949_v52 = vpop.xlane.xlu0 %1115  ;;  %v2951_v44 = vpop.xlane.xlu1 %1010 }
 0x343   :  { %vm1117_vm13 = vcmp.eq.f32.partialorder %v2853_v50, %v2949_v52  ;;  %vm1012_vm14 = vcmp.eq.f32.partialorder %v2855_v21, %v2951_v44  ;;  %v1021_v21 = vand.u32 65535, %v2883_v5 }
 0x344   :  { %v1118_v13 = vsel %vm1117_vm13, %v1113_v3, inf  ;;  %v1013_v27 = vsel %vm1012_vm14, %v1008_v8, inf  ;;  %v958_v3 = vshll.u32 %v957_v24, 16  ;;  %vm1554_vm14 = vcmask 392512  }
 0x345   :  { %1119 = vmin.xlane.f32.xlu2 %v1118_v13  ;;  %1014 = vmin.xlane.f32.xlu0 %v1013_v27  ;;  %v1077_v13 = vcvt.f32.s32 %v2906_v61  ;;  %v1141_v27 = vand.u32 65535, %v2898_v2 }
 0x347   :  { %v1143_v2 = vcvt.s32.f32 %v1141_v27 }
 0x34a   :  { %v2958_v56 = vpop.xlane.xlu2 %1130 }
 0x34b   :  { %vm1132_vm15 = vcmp.eq.f32.partialorder %v2865_v58, %v2958_v56  ;;  %v1023_v58 = vcvt.s32.f32 %v1021_v21 }
 0x34c   :  { %v1133_v53 = vsel %vm1132_vm15, %v1128_v16, inf }
 0x34d   :  { %1134 = vmin.xlane.f32.xlu1 %v1133_v53 }
 0x38a   :  { %v1268_v62 = vpop.f32.mrf.mxu1 }
 0x38b   :  { %v1487_v50 = vmul.f32 %v1268_v62, %v2129_v43  ;;  %v1367_v30 = vsub.f32 %v1268_v62, %v2235_v36 }
 0x38d   :  { %v1503_v41 = vadd.f32 %v1487_v50, %v1902_v22  ;;  %v1383_v38 = vmul.f32 %v1367_v30, %v1367_v30  ;;  %v1078_v50 = vshll.u32 %v1077_v13, 16  ;;  %v1548_v13 = vadd.s32 4294967264, %v2663_v54 }
 0x38f   :  { %1519 = vst.msk [vmem:[%s3181_s3] sm:$0xff] %vm44_vm0, %v1503_v41 }
 0x391   :  { %v2971_v19 = vpop.xlane.xlu1 %1025 }
 0x392   :  { %v1271_v59 = vpop.f32.mrf.mxu1  ;;  %vm1027_vm3 = vcmp.eq.f32.partialorder %v2888_v28, %v2971_v19 }
 0x393   :  { %v1368_v22 = vsub.f32 %v1271_v59, %v2260_v29  ;;  %v1488_v43 = vmul.f32 %v1271_v59, %v2166_v14  ;;  %v1028_v5 = vsel %vm1027_vm3, %v1023_v58, inf  ;;  %v1060_v42 = vpop.xlane.xlu0 %1059  ;;  %v1540_v14 = vadd.s32 4294967280, %v2663_v54 }
 0x394   :  { %1029 = vmin.xlane.f32.xlu2 %v1028_v5  ;;  %v1061_v39 = vcvt.f32.s32 %v1060_v42  ;;  %v1036_v58 = vand.u32 65535, %v2915_v37 }
 0x395   :  { %v1384_v36 = vmul.f32 %v1368_v22, %v1368_v22  ;;  %v1504_v48 = vadd.f32 %v1488_v43, %v1920_v32  ;;  %v1447_v32 = vsel %vm44_vm0, %v1383_v38, 0.0  ;;  %v972_v22 = vcvt.f32.s32 %v2918_v45 }
 0x396   :  { %v955_v8 = vpop.xlane.xlu2 %954  ;;  %v2979_v9 = vadd.s32 %v1063_v46, %v1061_v39  ;;  %v1038_v5 = vcvt.s32.f32 %v1036_v58  ;;  %v987_v46 = vcvt.f32.s32 %v2931_v49  ;;  %v1544_v38 = vadd.s32 4294967272, %v2663_v54 }
 0x397   :  { %1520 = vst.msk [vmem:[%s3181_s3 + $0x8] sm:$0xff] %vm44_vm0, %v1504_v48  ;;  %v956_v29 = vcvt.f32.s32 %v955_v8  ;;  %v1448_v28 = vsel %vm44_vm0, %v1384_v36, 0.0  ;;  %v973_v42 = vshll.u32 %v972_v22, 16  ;;  %v1002_v49 = vcvt.f32.s32 %v2941_v23 }
 0x398   :  { %vm1164_vm2 = vcmp.eq.s32.totalorder %v2663_v54, %v2979_v9  ;;  %v1449_v53 = vadd.f32 %v1448_v28, %v1447_v32  ;;  %v1122_v22 = vcvt.f32.s32 %v2949_v52 }
 0x399   :  { %v959_v11 = vadd.s32 %v958_v3, %v956_v29  ;;  %v1668_v16 = vsel %vm1164_vm2, 1.0, %v1833_v35  ;;  %vm1558_vm2 = vcmask 458112  }
 0x39a   :  { %1684 = vmatmul.msk.f32.vlgmr.msra.gmra.mxu3 %vm834_vm1, %v1668_v16 }
 0x39b   :  { %v1541_v62 = vperm.slane %v959_v11, %v1540_v14  ;;  %vm1157_vm7 = vcmp.eq.s32.totalorder %v2663_v54, %v959_v11  ;;  %v2995_v41 = vpop.xlane.xlu0 %1145  ;;  %v1075_v61 = vpop.xlane.xlu1 %1074  ;;  %v1107_v14 = vcvt.f32.s32 %v2939_v51 }
 0x39c   :  { %v1661_v21 = vsel %vm1157_vm7, 1.0, %v1833_v35  ;;  %1478 = vadd.xlane.f32.xlu2 %v1449_v53  ;;  %v1076_v30 = vcvt.f32.s32 %v1075_v61  ;;  %vm1147_vm6 = vcmp.eq.f32.partialorder %v2909_v57, %v2995_v41  ;;  %v1092_v57 = vcvt.f32.s32 %v2929_v60 }
 0x39d   :  { %v1543_v17 = vsel %vm1542_vm5, %v1541_v62, %v2877_v6  ;;  %1677 = vmatmul.msk.f32.gmra.mxu1 %vm834_vm1, %v1661_v21  ;;  %v1148_v24 = vsel %vm1147_vm6, %v1143_v2, inf  ;;  %v1108_v53 = vshll.u32 %v1107_v14, 16  ;;  %v1003_v62 = vshll.u32 %v1002_v49, 16 }
 0x39e   :  { %v3003_v59 = vadd.s32 %v1078_v50, %v1076_v30  ;;  %1149 = vmin.xlane.f32.xlu0 %v1148_v24  ;;  %v1093_v48 = vshll.u32 %v1092_v57, 16  ;;  %v1552_v21 = vadd.s32 4294967256, %v2663_v54 }
 0x3a0   :  { %v3006_v43 = vpop.xlane.xlu2 %1040  ;;  %vm1165_vm8 = vcmp.eq.s32.totalorder %v2663_v54, %v3003_v59 }
 0x3a1   :  { %vm1042_vm4 = vcmp.eq.f32.partialorder %v2922_v10, %v3006_v43  ;;  %v1669_v6 = vsel %vm1165_vm8, 1.0, %v1833_v35  ;;  %v988_v10 = vshll.u32 %v987_v46, 16  ;;  %vm1562_vm8 = vcmask 523712  }
 0x3a2   :  { %v1043_v37 = vsel %vm1042_vm4, %v1038_v5, inf  ;;  %1685 = vmatmul.msk.f32.gmra.mxu3 %vm834_vm1, %v1669_v6  ;;  %v1017_v5 = vcvt.f32.s32 %v2951_v44  ;;  %v1556_v44 = vadd.s32 4294967248, %v2663_v54 }
 0x3a3   :  { %1044 = vmin.xlane.f32.xlu1 %v1043_v37  ;;  %v970_v45 = vpop.xlane.xlu0 %969 }
 0x3a4   :  { %v971_v39 = vcvt.f32.s32 %v970_v45  ;;  %v1123_v45 = vshll.u32 %v1122_v22, 16 }
 0x3a6   :  { %v974_v3 = vadd.s32 %v973_v42, %v971_v39  ;;  %v1018_v42 = vshll.u32 %v1017_v5, 16 }
 0x3a7   :  { %v1090_v36 = vpop.xlane.xlu1 %1089 }
 0x3a8   :  { %v1091_v8 = vcvt.f32.s32 %v1090_v36  ;;  %v1545_v60 = vperm.slane %v974_v3, %v1544_v38  ;;  %v985_v28 = vpop.xlane.xlu2 %984  ;;  %vm1158_vm11 = vcmp.eq.s32.totalorder %v2663_v54, %v974_v3 }
 0x3a9   :  { %v986_v27 = vcvt.f32.s32 %v985_v28  ;;  %v1662_v11 = vsel %vm1158_vm11, 1.0, %v1833_v35  ;;  %vm1566_vm11 = vcmask 589312  }
 0x3aa   :  { %v3018_v29 = vadd.s32 %v1093_v48, %v1091_v8  ;;  %v1547_v32 = vsel %vm1546_vm9, %v1545_v60, %v1543_v17  ;;  %1678 = vmatmul.msk.f32.gmra.mxu1 %vm834_vm1, %v1662_v11 }
 0x3ab   :  { %v989_v51 = vadd.s32 %v988_v10, %v986_v27  ;;  %v1137_v10 = vcvt.f32.s32 %v2958_v56 }
 0x3ac   :  { %vm1166_vm12 = vcmp.eq.s32.totalorder %v2663_v54, %v3018_v29 }
 0x3ad   :  { %v1670_v16 = vsel %vm1166_vm12, 1.0, %v1833_v35  ;;  %v1549_v23 = vperm.slane %v989_v51, %v1548_v13  ;;  %vm1159_vm13 = vcmp.eq.s32.totalorder %v2663_v54, %v989_v51  ;;  %v1138_v13 = vshll.u32 %v1137_v10, 16 }
 0x3ae   :  { %1686 = vmatmul.msk.f32.gmra.mxu3 %vm834_vm1, %v1670_v16  ;;  %v1663_v6 = vsel %vm1159_vm13, 1.0, %v1833_v35  ;;  %v1032_v51 = vcvt.f32.s32 %v2971_v19  ;;  %vm1570_vm12 = vcmask 654912   ;;  %vm1574_vm13 = vcmask 720512  }
 0x3af   :  { %v1551_v30 = vsel %vm1550_vm10, %v1549_v23, %v1547_v32 }
 0x3b0   :  { %v1105_v50 = vpop.xlane.xlu0 %1104  ;;  %v1000_v61 = vpop.xlane.xlu1 %999 }
 0x3b1   :  { %v1106_v2 = vcvt.f32.s32 %v1105_v50  ;;  %v1001_v17 = vcvt.f32.s32 %v1000_v61 }
 0x3b2   :  { %1679 = vmatmul.msk.f32.gmra.mxu1 %vm834_vm1, %v1663_v6  ;;  %v1047_v6 = vcvt.f32.s32 %v3006_v43  ;;  %v1572_v43 = vadd.s32 4294967216, %v2663_v54 }
 0x3b3   :  { %v3031_v58 = vadd.s32 %v1108_v53, %v1106_v2  ;;  %v1004_v24 = vadd.s32 %v1003_v62, %v1001_v17  ;;  %v1033_v53 = vshll.u32 %v1032_v51, 16  ;;  %v1560_v62 = vadd.s32 4294967240, %v2663_v54 }
 0x3b4   :  { %v1152_v17 = vcvt.f32.s32 %v2995_v41 }
 0x3b5   :  { %v1553_v57 = vperm.slane %v1004_v24, %v1552_v21  ;;  %vm1167_vm15 = vcmp.eq.s32.totalorder %v2663_v54, %v3031_v58  ;;  %vm1160_vm3 = vcmp.eq.s32.totalorder %v2663_v54, %v1004_v24 }
 0x3b6   :  { %v1671_v37 = vsel %vm1167_vm15, 1.0, %v1833_v35  ;;  %v1664_v8 = vsel %vm1160_vm3, 1.0, %v1833_v35  ;;  %v1153_v5 = vshll.u32 %v1152_v17, 16  ;;  %vm1582_vm15 = vcmask 851712  }
 0x3b7   :  { %v1555_v46 = vsel %vm1554_vm14, %v1553_v57, %v1551_v30  ;;  %1687 = vmatmul.msk.f32.gmra.mxu3 %vm834_vm1, %v1671_v37  ;;  %vm1578_vm14 = vcmask 786112   ;;  %vm1586_vm3 = vcmask 917312  }
 0x3b8   :  { %v1120_v38 = vpop.xlane.xlu2 %1119  ;;  %v1015_v52 = vpop.xlane.xlu0 %1014 }
 0x3b9   :  { %v1121_v39 = vcvt.f32.s32 %v1120_v38  ;;  %v1016_v36 = vcvt.f32.s32 %v1015_v52  ;;  %v1048_v38 = vshll.u32 %v1047_v6, 16 }
 0x3ba   :  { %1680 = vmatmul.msk.f32.gmra.mxu1 %vm834_vm1, %v1664_v8 }
 0x3bb   :  { %v3043_v48 = vadd.s32 %v1123_v45, %v1121_v39  ;;  %v1019_v3 = vadd.s32 %v1018_v42, %v1016_v36  ;;  %v1568_v42 = vadd.s32 4294967224, %v2663_v54  ;;  %v1564_v39 = vadd.s32 4294967232, %v2663_v54 }
 0x3bd   :  { %v1557_v14 = vperm.slane %v1019_v3, %v1556_v44  ;;  %vm1168_vm5 = vcmp.eq.s32.totalorder %v2663_v54, %v3043_v48  ;;  %vm1161_vm7 = vcmp.eq.s32.totalorder %v2663_v54, %v1019_v3  ;;  %v1576_v3 = vadd.s32 4294967208, %v2663_v54 }
 0x3be   :  { %v1672_v60 = vsel %vm1168_vm5, 1.0, %v1833_v35  ;;  %v1665_v56 = vsel %vm1161_vm7, 1.0, %v1833_v35 }
 0x3bf   :  { %v1559_v28 = vsel %vm1558_vm2, %v1557_v14, %v1555_v46  ;;  %1688 = vmatmul.msk.f32.gmra.mxu3 %vm834_vm1, %v1672_v60  ;;  %v1580_v60 = vadd.s32 4294967200, %v2663_v54  ;;  %vm1594_vm2 = vcmask 1048512  }
 0x3c0   :  { %v1135_v49 = vpop.xlane.xlu1 %1134 }
 0x3c1   :  { %v1136_v27 = vcvt.f32.s32 %v1135_v49 }
 0x3c2   :  { %1681 = vmatmul.msk.f32.gmra.mxu1 %vm834_vm1, %v1665_v56  ;;  %v1588_v56 = vadd.s32 4294967184, %v2663_v54 }
 0x3c3   :  { %v3053_v11 = vadd.s32 %v1138_v13, %v1136_v27  ;;  %v1569_v13 = vperm.slane %v2979_v9, %v1568_v42  ;;  %v1592_v9 = vadd.s32 4294967176, %v2663_v54  ;;  %v3247_v42 = vld [vmem:[#allocation15_spill] sm:$0xff] }
 0x3c5   :  { %vm1169_vm6 = vcmp.eq.s32.totalorder %v2663_v54, %v3053_v11 }
 0x3c6   :  { %v1673_v32 = vsel %vm1169_vm6, 1.0, %v1833_v35 }
 0x3c7   :  { %1689 = vmatmul.msk.f32.gmra.mxu3 %vm834_vm1, %v1673_v32 }
 0x407   :  { %v1030_v16 = vpop.xlane.xlu2 %1029 }
 0x408   :  { %v1031_v23 = vcvt.f32.s32 %v1030_v16  ;;  %v1573_v16 = vperm.slane %v3003_v59, %v1572_v43 }
 0x40a   :  { %v1034_v50 = vadd.s32 %v1033_v53, %v1031_v23  ;;  %v1577_v53 = vperm.slane %v3018_v29, %v1576_v3  ;;  %v3251_v3 = vld [vmem:[#allocation10_spill] sm:$0xff] }
 0x40c   :  { %v1561_v61 = vperm.slane %v1034_v50, %v1560_v62  ;;  %vm1162_vm4 = vcmp.eq.s32.totalorder %v2663_v54, %v1034_v50 }
 0x40d   :  { %v1666_v2 = vsel %vm1162_vm4, 1.0, %v1833_v35 }
 0x40e   :  { %v1563_v21 = vsel %vm1562_vm8, %v1561_v61, %v1559_v28  ;;  %1682 = vmatmul.msk.f32.gmra.mxu1 %vm834_vm1, %v1666_v2  ;;  %v1584_v28 = vadd.s32 4294967192, %v2663_v54 }
 0x40f   :  { %v1479_v30 = vpop.xlane.xlu2 %1478 }
 0x410   :  { %v1480_v24 = vrot.slane %v1479_v30, 4  ;;  %v1585_v29 = vperm.slane %v3043_v48, %v1584_v28  ;;  %v3253_v28 = vld [vmem:[#allocation13_spill] sm:$0xff] }
 0x411   :  { %v1150_v19 = vpop.xlane.xlu0 %1149 }
 0x412   :  { %v1481_v22 = vadd.f32 %v1480_v24, %v1479_v30  ;;  %v1151_v57 = vcvt.f32.s32 %v1150_v19 }
 0x414   :  { %v1482_v37 = vrot.slane %v1481_v22, 2  ;;  %v1154_v46 = vadd.s32 %v1153_v5, %v1151_v57 }
 0x416   :  { %v1483_v45 = vadd.f32 %v1482_v37, %v1481_v22  ;;  %v1045_v52 = vpop.xlane.xlu1 %1044  ;;  %vm1170_vm9 = vcmp.eq.s32.totalorder %v2663_v54, %v1154_v46  ;;  %v3246_v37 = vld [vmem:[#allocation11_spill] sm:$0xff] }
 0x417   :  { %v1046_v41 = vcvt.f32.s32 %v1045_v52  ;;  %v1674_v44 = vsel %vm1170_vm9, 1.0, %v1833_v35 }
 0x418   :  { %v1484_v36 = vrot.slane %v1483_v45, 1  ;;  %1690 = vmatmul.msk.f32.gmra.mxu3 %vm834_vm1, %v1674_v44 }
 0x419   :  { %v1049_v8 = vadd.s32 %v1048_v38, %v1046_v41  ;;  %v3248_v38 = vld [vmem:[#allocation12_spill] sm:$0xff]  ;;  %v3249_v41 = vld [vmem:[#allocation17_spill] sm:$0xff] }
 0x41a   :  { %v1274_v10 = vpop.f32.mrf.mxu1  ;;  %v1485_v14 = vadd.f32 %v1484_v36, %v1483_v45 }
 0x41b   :  { %v1489_v49 = vmul.f32 %v1274_v10, %v2388_v31  ;;  %v1565_v27 = vperm.slane %v1049_v8, %v1564_v39  ;;  %vm1163_vm10 = vcmp.eq.s32.totalorder %v2663_v54, %v1049_v8  ;;  %v1589_v54 = vperm.slane %v3053_v11, %v1588_v56  ;;  %v3252_v10 = vld [vmem:[#allocation8_spill] sm:$0xff] }
 0x41c   :  { %1707 = vpush %v1485_v14  ;;  %v1667_v51 = vsel %vm1163_vm10, 1.0, %v1833_v35  ;;  %v1581_v35 = vperm.slane %v3031_v58, %v1580_v60 }
 0x41d   :  { %v1505_v32 = vadd.f32 %v1489_v49, %v2090_v33  ;;  %v1567_v62 = vsel %vm1566_vm11, %v1565_v27, %v1563_v21  ;;  %1683 = vmatmul.msk.f32.gmra.mxu1 %vm834_vm1, %v1667_v51  ;;  %v1295_v31 = vpop.f32.mrf.mxu3  ;;  %vm1590_vm1 = vcmask 982912   ;;  %v3254_v27 = vld [vmem:[#allocation18_spill] sm:$0xff] }
 0x41e   :  { %v1571_v23 = vsel %vm1570_vm12, %v1569_v13, %v1567_v62  ;;  %v1496_v33 = vmul.f32 %v1295_v31, %v2337_v34  ;;  %v1593_v34 = vperm.slane %v1154_v46, %v1592_v9 }
 0x41f   :  { %1521 = vst.msk [vmem:[%s3181_s3 + $0x10] sm:$0xff] %vm44_vm0, %v1505_v32  ;;  %v1575_v59 = vsel %vm1574_vm13, %v1573_v16, %v1571_v23  ;;  %v3255_v32 = vld [vmem:[#allocation9_spill] sm:$0xff]  ;;  %v3256_v16 = vld [vmem:[#allocation16_spill] sm:$0xff] }
 0x420   :  { %v1512_v50 = vadd.f32 %v1496_v33, %v2068_v25  ;;  %v1579_v61 = vsel %vm1578_vm14, %v1577_v53, %v1575_v59 }
 0x421   :  { %v1583_v2 = vsel %vm1582_vm15, %v1581_v35, %v1579_v61 }
 0x422   :  { %1528 = vst.msk [vmem:[%s3181_s3 + $0x48] sm:$0xff] %vm44_vm0, %v1512_v50  ;;  %v1587_v58 = vsel %vm1586_vm3, %v1585_v29, %v1583_v2 }
 0x423   :  { %v1591_v25 = vsel %vm1590_vm1, %v1589_v54, %v1587_v58 }
 0x424   :  { %v1595_v48 = vsel %vm1594_vm2, %v1593_v34, %v1591_v25 }
 0x425   :  { %v1298_v21 = vpop.f32.mrf.mxu3  ;;  %1596 = vst [vmem:[#allocation2] sm:$0x1] %v1595_v48 }
 0x426   :  { %v1497_v17 = vmul.f32 %v1298_v21, %v2269_v1  ;;  %1611 = dma.vmem_to_hbm [thread:$0]  %s1607_s0, 16, %s1609_s23, [#allocation3]  }
 0x427   :  { %v1277_v11 = vpop.f32.mrf.mxu1 }
 0x428   :  { %v1490_v30 = vmul.f32 %v1277_v11, %v2271_v18  ;;  %v1513_v24 = vadd.f32 %v1497_v17, %v1989_v55 }
 0x42a   :  { %v1506_v19 = vadd.f32 %v1490_v30, %v2012_v63  ;;  %1529 = vst.msk [vmem:[%s3181_s3 + $0x50] sm:$0xff] %vm44_vm0, %v1513_v24 }
 0x42c   :  { %1522 = vst.msk [vmem:[%s3181_s3 + $0x18] sm:$0xff] %vm44_vm0, %v1506_v19 }
 0x42f   :  { %v1280_v22 = vpop.f32.mrf.mxu1 }
 0x430   :  { %v1491_v5 = vmul.f32 %v1280_v22, %v2479_v4 }
 0x431   :  { %v1301_v1 = vpop.f32.mrf.mxu3 }
 0x432   :  { %v1498_v18 = vmul.f32 %v1301_v1, %v2437_v7  ;;  %v1507_v55 = vadd.f32 %v1491_v5, %v2132_v12 }
 0x434   :  { %v1514_v63 = vadd.f32 %v1498_v18, %v2095_v0  ;;  %1523 = vst.msk [vmem:[%s3181_s3 + $0x20] sm:$0xff] %vm44_vm0, %v1507_v55 }
 0x436   :  { %1530 = vst.msk [vmem:[%s3181_s3 + $0x58] sm:$0xff] %vm44_vm0, %v1514_v63 }
 0x437   :  { %v1283_v6 = vpop.f32.mrf.mxu1 }
 0x438   :  { %v1492_v4 = vmul.f32 %v1283_v6, %v2510_v40 }
 0x43a   :  { %v1304_v57 = vpop.f32.mrf.mxu3  ;;  %v1508_v12 = vadd.f32 %v1492_v4, %v2169_v15 }
 0x43b   :  { %v1499_v7 = vmul.f32 %v1304_v57, %v2485_v20 }
 0x43c   :  { %1524 = vst.msk [vmem:[%s3181_s3 + $0x28] sm:$0xff] %vm44_vm0, %v1508_v12 }
 0x43d   :  { %v1515_v0 = vadd.f32 %v1499_v7, %v3246_v37 }
 0x43f   :  { %1531 = vst.msk [vmem:[%s3181_s3 + $0x60] sm:$0xff] %vm44_vm0, %v1515_v0  ;;  %v1286_v46 = vpop.f32.mrf.mxu1 }
 0x440   :  { %v1493_v40 = vmul.f32 %v1286_v46, %v2561_v26 }
 0x442   :  { %v1307_v45 = vpop.f32.mrf.mxu3  ;;  %v1509_v15 = vadd.f32 %v1493_v40, %v3247_v42 }
 0x443   :  { %v1500_v20 = vmul.f32 %v1307_v45, %v2523_v47  ;;  %v3250_v47 = vld [vmem:[#allocation14_spill] sm:$0xff] }
 0x444   :  { %1525 = vst.msk [vmem:[%s3181_s3 + $0x30] sm:$0xff] %vm44_vm0, %v1509_v15 }
 0x445   :  { %v1516_v52 = vadd.f32 %v1500_v20, %v3248_v38 }
 0x447   :  { %1532 = vst.msk [vmem:[%s3181_s3 + $0x68] sm:$0xff] %vm44_vm0, %v1516_v52 }
 0x44a   :  { %v1310_v39 = vpop.f32.mrf.mxu3 }
 0x44b   :  { %v1501_v44 = vmul.f32 %v1310_v39, %v3249_v41 }
 0x44d   :  { %v1517_v26 = vadd.f32 %v1501_v44, %v3250_v47  ;;  %s1708_s22 = spop %1707 }
 0x44e   :  { %v1597_v36 = vstv %s1708_s22 }
 0x44f   :  { %1533 = vst.msk [vmem:[%s3181_s3 + $0x70] sm:$0xff] %vm44_vm0, %v1517_v26 }
 0x450   :  { %1598 = vst [vmem:[#allocation4] sm:$0x1] %v1597_v36 }
 0x451   :  { %1622 = dma.vmem_to_hbm [thread:$0]  %s1618_s16, 16, %s1620_s19, [#allocation5]  }
 0x48b   :  { %v1289_v43 = vpop.f32.mrf.mxu1 }
 0x48c   :  { %v1494_v8 = vmul.f32 %v1289_v43, %v3251_v3 }
 0x48e   :  { %v1510_v14 = vadd.f32 %v1494_v8, %v3252_v10 }
 0x490   :  { %1526 = vst.msk [vmem:[%s3181_s3 + $0x38] sm:$0xff] %vm44_vm0, %v1510_v14 }
 0x49a   :  { %v1292_v60 = vpop.f32.mrf.mxu1 }
 0x49b   :  { %v1495_v49 = vmul.f32 %v1292_v60, %v3253_v28  ;;  %v1313_v13 = vpop.f32.mrf.mxu3 }
 0x49c   :  { %v1502_v56 = vmul.f32 %v1313_v13, %v3254_v27 }
 0x49d   :  { %v1511_v51 = vadd.f32 %v1495_v49, %v3255_v32 }
 0x49e   :  { %v1518_v53 = vadd.f32 %v1502_v56, %v3256_v16 }
 0x49f   :  { %1527 = vst.msk [vmem:[%s3181_s3 + $0x40] sm:$0xff] %vm44_vm0, %v1511_v51 }
 0x4a0   :  { %1534 = vst.msk [vmem:[%s3181_s3 + $0x78] sm:$0xff] %vm44_vm0, %v1518_v53 }
 0x4a1   :  { %1828 = dma.done.wait [#allocation3], 16  }
 0x4a2   :  { %1829 = vsyncadd [#allocation3], 4294967280 }
 0x4a3   :  { %1830 = dma.done.wait [#allocation5], 16  }
 0x4a4   :  { %1831 = vsyncadd [#allocation5], 4294967280 }
 0x4a5   :  { %1633 = vsyncpa [#allocation3], 1 }
 0x4a6   :  { %1634 = vsyncpa [#allocation5], 1 }

</bundles_post_ra>
